<compile_context>
chip_gen: v7x
topology: tpu7x:2x2x1
jax: 0.10.0
libtpu: 0.0.40
codegen_flags: <defaults>
</compile_context>

<pallas_src>
import math

import jax
import jax.numpy as jnp
import numpy as np
from jax import lax
from jax.experimental import pallas as pl
from jax.experimental.pallas import tpu as pltpu

_LANE = 128
_SUBLANE = 8


def _vmem_limit_bytes():
    """Chip-aware VMEM limit (leave ~25% of capacity for compiler-internal scratch)."""
    cap = 64 << 20
    try:
        c = int(getattr(pltpu.get_tpu_info(), "vmem_capacity_bytes", 0))
        if c >= (16 << 20):
            cap = c
    except Exception:
        pass
    return min((cap * 3) // 4, 112 << 20)


def _default_depthwise_on_mxu():
    """Fold depthwise into 9 MXU matmuls except on v5e (small MXU; VPU path wins there)."""
    try:
        kind = jax.devices()[0].device_kind.lower()
    except Exception:
        return True
    if "v5 lite" in kind or "v5lite" in kind or "v5e" in kind:
        return False
    return True


def _tile_footprint_bytes(th, w, cinp, coutp, act_bytes, out_bytes, on_mxu):
    """Per-grid-step VMEM footprint for a TILE_H=th row tile."""
    wp = w + 2
    halo_in = 2 * (th + 2) * wp * cinp * act_bytes           # double-buffered halo input
    out_blk = 2 * th * w * coutp * out_bytes                  # double-buffered output block
    if on_mxu:
        weights = 9 * cinp * coutp * act_bytes                # 9 fused (Cinp, Coutp) mats
        temps = th * w * coutp * 4 + (th + 2) * w * cinp * act_bytes
    else:
        weights = 9 * cinp * 4 + cinp * coutp * act_bytes
        temps = th * w * cinp * 4 + th * w * coutp * 4 + (th + 2) * w * cinp * 4
    weights = 2 * (weights + coutp * 4)                       # Pallas double-buffers residents
    return halo_in + out_blk + weights + temps + (4 << 20)    # + compiler scratch headroom


def _pick_tile_h(h, w, cinp, coutp, act_bytes, out_bytes, on_mxu, budget):
    """Largest row-tile that fits the VMEM budget (bigger tiles = fewer grid steps)."""
    def fits(th):
        return _tile_footprint_bytes(th, w, cinp, coutp, act_bytes, out_bytes,
                                     on_mxu) <= budget
    if fits(h):
        return h                                   # whole (padded) image per grid step
    # Multi-tile: keep tile_h * W a multiple of 8 so output blocks stay sublane-aligned.
    step = _SUBLANE // math.gcd(w, _SUBLANE)
    th = max((h // step) * step, step)
    while th > step and not fits(th):
        th -= step
    return th


def _make_compute(tile_h, w, cinp, coutp, on_mxu):
    """Per-tile compute. `load_kw(kw)` yields the (tile_h+2, w, cinp) column-shifted slab."""
    rows = tile_h * w

    if on_mxu:
        def compute(load_kw, wk_ref, b_ref, o_ref):
            # Depthwise + pointwise fused as 9 MXU matmuls with f32 accumulation:
            #   out = sum_{kh,kw} x[.., r+kh, c+kw, :] @ (diag(wdw[kh,kw]) @ Wpw) + bias
            acc = jnp.zeros((rows, coutp), jnp.float32)
            for kw in range(3):
                xs = load_kw(kw)                               # (tile_h + 2, w, cinp)
                for kh in range(3):
                    lhs = xs[kh:kh + tile_h].reshape(rows, cinp)
                    acc = acc + jnp.dot(lhs, wk_ref[kh * 3 + kw],
                                        preferred_element_type=jnp.float32)
            o_ref[...] = (acc + b_ref[...].astype(jnp.float32)).astype(o_ref.dtype)
        return compute

    def compute(load_kw, wdw_ref, wpw_ref, b_ref, o_ref):
        # v5e path: depthwise on the VPU (9 shifted MACs), pointwise on the MXU.
        # TODO(synk): restructure with an in-vreg per-sublane-group accumulator
        # (lax.fori_loop(..., unroll=True)) to cut vst-slot traffic further on v5e.
        wdw = wdw_ref[...].astype(jnp.float32)                 # (3, 3, cinp)
        acc = jnp.zeros((tile_h, w, cinp), jnp.float32)
        for kw in range(3):
            xs = load_kw(kw).astype(jnp.float32)               # (tile_h + 2, w, cinp)
            for kh in range(3):
                acc = acc + xs[kh:kh + tile_h] * wdw[kh, kw][None, None, :]
        lhs = acc.reshape(rows, cinp).astype(wpw_ref.dtype)
        out = jnp.dot(lhs, wpw_ref[...], preferred_element_type=jnp.float32)
        o_ref[...] = (out + b_ref[...].astype(jnp.float32)).astype(o_ref.dtype)
    return compute


def _make_single_tile_kernel(tile_h, w, cinp, coutp, on_mxu):
    """n_tiles == 1: input is an auto-pipelined BlockSpec block (no manual DMA)."""
    compute = _make_compute(tile_h, w, cinp, coutp, on_mxu)

    def kernel(x_ref, *refs):
        # x_ref: (tile_h + 2, w + 2, cinp) — the whole spatially padded image.
        compute(lambda kw: x_ref[:, kw:kw + w, :], *refs)

    return kernel


def _make_halo_kernel(tile_h, w, cinp, coutp, on_mxu):
    """n_tiles > 1: manual double-buffered DMA of the tile_h + 2 halo rows."""
    halo_h = tile_h + 2
    compute = _make_compute(tile_h, w, cinp, coutp, on_mxu)

    def kernel(x_hbm, *refs):
        *weight_refs, o_ref, xbuf, sem = refs
        # x_hbm: (N, Hpad+2, W+2, cinp) in HBM; xbuf: (2, halo_h, W+2, cinp) VMEM scratch.
        n = pl.program_id(0)
        h = pl.program_id(1)
        n_tiles = pl.num_programs(1)
        slot = h % 2

        def start_copy(tile, s):
            pltpu.make_async_copy(
                x_hbm.at[n, pl.ds(tile * tile_h, halo_h)], xbuf.at[s], sem.at[s],
            ).start()

        # Prime at the start of each batch's row sweep.  The H-tile axis is 'arbitrary'
        # (sequential per core), so this in-order prime/prefetch scheme is safe even
        # with the batch axis megacore-sharded.
        @pl.when(h == 0)
        def _():
            start_copy(0, 0)

        # Prefetch the next row-tile of this batch into the other slot.
        # TODO(synk): also prefetch the next batch's first tile at h == n_tiles - 1 once
        # a per-core-range-aware scheme avoids dangling un-waited DMAs at core edges.
        @pl.when(h + 1 < n_tiles)
        def _():
            start_copy(h + 1, 1 - slot)

        pltpu.make_async_copy(
            x_hbm.at[n, pl.ds(h * tile_h, halo_h)], xbuf.at[slot], sem.at[slot],
        ).wait()

        compute(lambda kw: xbuf[slot, :, kw:kw + w, :], *weight_refs, o_ref)

    return kernel


def separable_conv_nhwc(x_nhwc, w_dw, w_pw, b_pw, *, compute_dtype=None, tile_h=None,
                        depthwise_on_mxu=None, vmem_limit_bytes=None):
    """SeparableConv forward on NHWC activations (preferred entry: no layout passes).

    x_nhwc: (N, H, W, Cin); w_dw: (Cin, 1, 3, 3); w_pw: (Cout, Cin, 1, 1); b_pw: (Cout,)
    compute_dtype: e.g. jnp.bfloat16 for bf16 activations / weights with f32
        accumulation (recommended on v6e / v7x; keep float32 on v5e).
    """
    n, h, w, cin = x_nhwc.shape
    cout = w_pw.shape[0]
    out_dtype = x_nhwc.dtype
    cdtype = jnp.dtype(compute_dtype) if compute_dtype is not None else jnp.dtype(out_dtype)

    if depthwise_on_mxu is None:
        depthwise_on_mxu = _default_depthwise_on_mxu()
    if vmem_limit_bytes is None:
        vmem_limit_bytes = _vmem_limit_bytes()

    # TF-"same" padding for kernel=3, stride=1, dilation=1 (== Conv2dSamePadding).
    pad_h = max((math.ceil(h / 1) - 1) * 1 + (3 - 1) * 1 + 1 - h, 0)   # == 2
    pad_w = max((math.ceil(w / 1) - 1) * 1 + (3 - 1) * 1 + 1 - w, 0)   # == 2
    ph0, ph1 = pad_h // 2, pad_h - pad_h // 2
    pw0, pw1 = pad_w // 2, pad_w - pad_w // 2

    # Lane-dense channels: zero-pad Cin / Cout up to multiples of 128.
    cinp = -(-cin // _LANE) * _LANE
    coutp = -(-cout // _LANE) * _LANE

    act_bytes = cdtype.itemsize
    out_bytes = jnp.dtype(out_dtype).itemsize
    if tile_h is None:
        tile_h = _pick_tile_h(h, w, cinp, coutp, act_bytes, out_bytes,
                              depthwise_on_mxu, vmem_limit_bytes)
    tile_h = min(max(int(tile_h), 1), h)
    n_tiles = -(-h // tile_h)
    hpad = n_tiles * tile_h                      # H rounded up to a tile multiple
    wp = w + pw0 + pw1

    # Single fused pad: "same" halo + H -> tile multiple + Cin -> Cinp channel padding.
    # TODO(synk): for small Cin, DMA only the real channels into a pre-zeroed VMEM
    # buffer instead of materializing the Cin -> Cinp padding in HBM.
    x_pad = jnp.pad(x_nhwc.astype(cdtype),
                    ((0, 0), (ph0, ph1 + hpad - h), (pw0, pw1), (0, cinp - cin)))

    wdw_t = jnp.transpose(w_dw[:, 0, :, :], (1, 2, 0)).astype(jnp.float32)   # (3,3,Cin)
    wpw_t = jnp.transpose(w_pw[:, :, 0, 0], (1, 0)).astype(jnp.float32)      # (Cin,Cout)
    b_k = jnp.pad(b_pw, (0, coutp - cout)).reshape(1, coutp).astype(jnp.float32)

    # TODO(synk): pipeline_mode=pl.Buffered(1) on the resident weight specs would free
    # the second copy of the (9, Cinp, Coutp) block on VMEM-tight chips (v7x).
    if depthwise_on_mxu:
        # W_k = diag(wdw[kh, kw]) @ Wpw for each of the 9 taps: (9, Cinp, Coutp).
        wk = wdw_t.reshape(9, cin)[:, :, None] * wpw_t[None, :, :]
        wk_k = jnp.pad(wk, ((0, 0), (0, cinp - cin), (0, coutp - cout))).astype(cdtype)
        weight_ops = (wk_k, b_k)
        weight_specs_1 = [pl.BlockSpec((9, cinp, coutp), lambda b: (0, 0, 0)),
                          pl.BlockSpec((1, coutp), lambda b: (0, 0))]
        weight_specs_2 = [pl.BlockSpec((9, cinp, coutp), lambda b, t: (0, 0, 0)),
                          pl.BlockSpec((1, coutp), lambda b, t: (0, 0))]
    else:
        wdw_k = jnp.pad(wdw_t, ((0, 0), (0, 0), (0, cinp - cin)))            # f32
        wpw_k = jnp.pad(wpw_t, ((0, cinp - cin), (0, coutp - cout))).astype(cdtype)
        weight_ops = (wdw_k, wpw_k, b_k)
        weight_specs_1 = [pl.BlockSpec((3, 3, cinp), lambda b: (0, 0, 0)),
                          pl.BlockSpec((cinp, coutp), lambda b: (0, 0)),
                          pl.BlockSpec((1, coutp), lambda b: (0, 0))]
        weight_specs_2 = [pl.BlockSpec((3, 3, cinp), lambda b, t: (0, 0, 0)),
                          pl.BlockSpec((cinp, coutp), lambda b, t: (0, 0)),
                          pl.BlockSpec((1, coutp), lambda b, t: (0, 0))]

    out_shape = jax.ShapeDtypeStruct((n, hpad * w, coutp), out_dtype)

    if n_tiles == 1:
        # Whole padded image per grid step: Pallas auto double-buffers across batches.
        kernel = _make_single_tile_kernel(tile_h, w, cinp, coutp, depthwise_on_mxu)
        out_flat = pl.pallas_call(
            kernel,
            out_shape=out_shape,
            grid_spec=pltpu.PrefetchScalarGridSpec(
                num_scalar_prefetch=0,
                grid=(n,),
                in_specs=[pl.BlockSpec((None, hpad + pad_h, wp, cinp),
                                       lambda b: (b, 0, 0, 0))] + weight_specs_1,
                out_specs=pl.BlockSpec((None, hpad * w, coutp), lambda b: (b, 0, 0)),
            ),
            compiler_params=pltpu.CompilerParams(
                dimension_semantics=("parallel",),
                vmem_limit_bytes=int(vmem_limit_bytes)),
        )(x_pad, *weight_ops)
    else:
        # TODO(synk): on v7x with tiny N, also split H across the two TensorCores.
        kernel = _make_halo_kernel(tile_h, w, cinp, coutp, depthwise_on_mxu)
        halo_h = tile_h + 2
        out_flat = pl.pallas_call(
            kernel,
            out_shape=out_shape,
            grid_spec=pltpu.PrefetchScalarGridSpec(
                num_scalar_prefetch=0,
                grid=(n, n_tiles),
                in_specs=[pl.BlockSpec(memory_space=pl.ANY)] + weight_specs_2,
                out_specs=pl.BlockSpec((None, tile_h * w, coutp), lambda b, t: (b, t, 0)),
                scratch_shapes=[
                    pltpu.VMEM((2, halo_h, wp, cinp), cdtype),   # double-buffered halos
                    pltpu.SemaphoreType.DMA((2,)),
                ],
            ),
            compiler_params=pltpu.CompilerParams(
                dimension_semantics=("parallel", "arbitrary"),
                vmem_limit_bytes=int(vmem_limit_bytes)),
        )(x_pad, *weight_ops)

    return out_flat[:, :h * w, :cout].reshape(n, h, w, cout)


def separable_conv(x_nchw, w_dw, w_pw, b_pw, **kwargs):
    """SeparableConv forward with PyTorch NCHW layout (matches the nn.Module spec).

    Layout plumbing only; prefer `separable_conv_nhwc` in channels-last pipelines so
    the NCHW<->NHWC transposes (extra HBM passes) disappear.
    """
    x_nhwc = jnp.transpose(x_nchw, (0, 2, 3, 1))
    out_nhwc = separable_conv_nhwc(x_nhwc, w_dw, w_pw, b_pw, **kwargs)
    return jnp.transpose(out_nhwc, (0, 3, 1, 2))


def _reference(x_nchw, w_dw, w_pw, b_pw):
    """Pure-JAX reference (mirrors PyTorch F.conv2d semantics)."""
    cin = x_nchw.shape[1]
    dn = ("NCHW", "OIHW", "NCHW")
    dw = lax.conv_general_dilated(
        x_nchw, w_dw, window_strides=(1, 1), padding=[(1, 1), (1, 1)],
        feature_group_count=cin, dimension_numbers=dn,
        precision=lax.Precision.HIGHEST)
    pw = lax.conv_general_dilated(
        dw, w_pw, window_strides=(1, 1), padding=[(0, 0), (0, 0)],
        dimension_numbers=dn, precision=lax.Precision.HIGHEST)
    return pw + b_pw.reshape(1, -1, 1, 1)


if __name__ == "__main__":
    key = jax.random.PRNGKey(0)
    k_x, k_dw, k_pw, k_b = jax.random.split(key, 4)

    N, Cin, H, W = 2, 4, 16, 16
    Cout = Cin  # SeparableConv default: out_channels = in_channels

    x = jax.random.normal(k_x, (N, Cin, H, W), dtype=jnp.float32)
    w_dw = jax.random.normal(k_dw, (Cin, 1, 3, 3), dtype=jnp.float32) * 0.2
    w_pw = jax.random.normal(k_pw, (Cout, Cin, 1, 1), dtype=jnp.float32) * 0.2
    b_pw = jax.random.normal(k_b, (Cout,), dtype=jnp.float32) * 0.1

    ref = _reference(x, w_dw, w_pw, b_pw)

    # Auto config (whole image per grid step -> BlockSpec-pipelined single-tile variant).
    out = separable_conv(x, w_dw, w_pw, b_pw)
    jax.block_until_ready(out)
    np.testing.assert_allclose(np.asarray(out), np.asarray(ref), rtol=2e-4, atol=2e-4)

    # Multi-tile halo-DMA variant with the depthwise folded into the MXU.
    out_t = separable_conv(x, w_dw, w_pw, b_pw, tile_h=4, depthwise_on_mxu=True)
    jax.block_until_ready(out_t)
    np.testing.assert_allclose(np.asarray(out_t), np.asarray(ref), rtol=2e-4, atol=2e-4)

    # Non-divisor tile (exercises the padded last tile) on the VPU path (v5e config).
    out_v = separable_conv(x, w_dw, w_pw, b_pw, tile_h=3, depthwise_on_mxu=False)
    jax.block_until_ready(out_v)
    np.testing.assert_allclose(np.asarray(out_v), np.asarray(ref), rtol=2e-4, atol=2e-4)

    # bf16 activations / weights with f32 accumulation (v6e / v7x MXU path).
    out_b = separable_conv(x, w_dw, w_pw, b_pw, compute_dtype=jnp.bfloat16, tile_h=8,
                           depthwise_on_mxu=True)
    jax.block_until_ready(out_b)
    np.testing.assert_allclose(np.asarray(out_b), np.asarray(ref), rtol=1e-1, atol=1e-1)

    print("KERNEL_OK")
</pallas_src>

<mosaic_0001>
module attributes {stable_mosaic.version = 11 : i64} {
  func.func @kernel(%arg0: i32, %arg1: memref<1x18x18x128xf32, #tpu.memory_space<vmem>>, %arg2: memref<9x128x128xf32, #tpu.memory_space<vmem>>, %arg3: memref<1x128xf32, #tpu.memory_space<vmem>>, %arg4: memref<1x256x128xf32, #tpu.memory_space<vmem>>) attributes {dimension_semantics = [#tpu.dimension_semantics<parallel>], iteration_bounds = array<i64: 2>, scalar_prefetch = 0 : i64, scratch_operands = 0 : i64, tpu.core_type = #tpu.core_type<tc>, window_params = [{transform_indices = @transform_0, window_bounds = array<i64: 1, 18, 18, 128>}, {pipeline_mode = #tpu.pipeline_mode<synchronous>, transform_indices = @transform_1, window_bounds = array<i64: 9, 128, 128>}, {pipeline_mode = #tpu.pipeline_mode<synchronous>, transform_indices = @transform_2, window_bounds = array<i64: 1, 128>}, {transform_indices = @transform_3, window_bounds = array<i64: 1, 256, 128>}]} {
    %cst = arith.constant 0.000000e+00 : f32
    %0 = vector.broadcast %cst : f32 to vector<256x128xf32>
    %c0 = arith.constant 0 : index
    %c0_0 = arith.constant 0 : index
    %c0_1 = arith.constant 0 : index
    %c0_2 = arith.constant 0 : index
    %1 = vector.load %arg1[%c0, %c0_0, %c0_1, %c0_2] : memref<1x18x18x128xf32, #tpu.memory_space<vmem>>, vector<1x18x16x128xf32>
    %2 = vector.shape_cast %1 : vector<1x18x16x128xf32> to vector<18x16x128xf32>
    %3 = vector.extract_strided_slice %2 {offsets = [0, 0, 0], sizes = [16, 16, 128], strides = [1, 1, 1]} : vector<18x16x128xf32> to vector<16x16x128xf32>
    %4 = vector.shape_cast %3 : vector<16x16x128xf32> to vector<256x128xf32>
    %c0_3 = arith.constant 0 : index
    %c0_4 = arith.constant 0 : index
    %c0_5 = arith.constant 0 : index
    %5 = vector.load %arg2[%c0_3, %c0_4, %c0_5] : memref<9x128x128xf32, #tpu.memory_space<vmem>>, vector<1x128x128xf32>
    %6 = vector.shape_cast %5 : vector<1x128x128xf32> to vector<128x128xf32>
    %cst_6 = arith.constant dense<0.000000e+00> : vector<256x128xf32>
    %7 = tpu.matmul %4, %6, %cst_6 {dimension_numbers = #tpu.dot_dimension_numbers<[1], [0], [0], [1], [0, 0, 1, 1], [], []>} : vector<256x128xf32>, vector<128x128xf32>, vector<256x128xf32> -> vector<256x128xf32>
    %8 = arith.addf %0, %7 : vector<256x128xf32>
    %9 = vector.extract_strided_slice %2 {offsets = [1, 0, 0], sizes = [16, 16, 128], strides = [1, 1, 1]} : vector<18x16x128xf32> to vector<16x16x128xf32>
    %10 = vector.shape_cast %9 : vector<16x16x128xf32> to vector<256x128xf32>
    %c3 = arith.constant 3 : index
    %c0_7 = arith.constant 0 : index
    %c0_8 = arith.constant 0 : index
    %11 = vector.load %arg2[%c3, %c0_7, %c0_8] : memref<9x128x128xf32, #tpu.memory_space<vmem>>, vector<1x128x128xf32>
    %12 = vector.shape_cast %11 : vector<1x128x128xf32> to vector<128x128xf32>
    %cst_9 = arith.constant dense<0.000000e+00> : vector<256x128xf32>
    %13 = tpu.matmul %10, %12, %cst_9 {dimension_numbers = #tpu.dot_dimension_numbers<[1], [0], [0], [1], [0, 0, 1, 1], [], []>} : vector<256x128xf32>, vector<128x128xf32>, vector<256x128xf32> -> vector<256x128xf32>
    %14 = arith.addf %8, %13 : vector<256x128xf32>
    %15 = vector.extract_strided_slice %2 {offsets = [2, 0, 0], sizes = [16, 16, 128], strides = [1, 1, 1]} : vector<18x16x128xf32> to vector<16x16x128xf32>
    %16 = vector.shape_cast %15 : vector<16x16x128xf32> to vector<256x128xf32>
    %c6 = arith.constant 6 : index
    %c0_10 = arith.constant 0 : index
    %c0_11 = arith.constant 0 : index
    %17 = vector.load %arg2[%c6, %c0_10, %c0_11] : memref<9x128x128xf32, #tpu.memory_space<vmem>>, vector<1x128x128xf32>
    %18 = vector.shape_cast %17 : vector<1x128x128xf32> to vector<128x128xf32>
    %cst_12 = arith.constant dense<0.000000e+00> : vector<256x128xf32>
    %19 = tpu.matmul %16, %18, %cst_12 {dimension_numbers = #tpu.dot_dimension_numbers<[1], [0], [0], [1], [0, 0, 1, 1], [], []>} : vector<256x128xf32>, vector<128x128xf32>, vector<256x128xf32> -> vector<256x128xf32>
    %20 = arith.addf %14, %19 : vector<256x128xf32>
    %c0_13 = arith.constant 0 : index
    %c0_14 = arith.constant 0 : index
    %c1 = arith.constant 1 : index
    %c0_15 = arith.constant 0 : index
    %21 = vector.load %arg1[%c0_13, %c0_14, %c1, %c0_15] : memref<1x18x18x128xf32, #tpu.memory_space<vmem>>, vector<1x18x16x128xf32>
    %22 = vector.shape_cast %21 : vector<1x18x16x128xf32> to vector<18x16x128xf32>
    %23 = vector.extract_strided_slice %22 {offsets = [0, 0, 0], sizes = [16, 16, 128], strides = [1, 1, 1]} : vector<18x16x128xf32> to vector<16x16x128xf32>
    %24 = vector.shape_cast %23 : vector<16x16x128xf32> to vector<256x128xf32>
    %c1_16 = arith.constant 1 : index
    %c0_17 = arith.constant 0 : index
    %c0_18 = arith.constant 0 : index
    %25 = vector.load %arg2[%c1_16, %c0_17, %c0_18] : memref<9x128x128xf32, #tpu.memory_space<vmem>>, vector<1x128x128xf32>
    %26 = vector.shape_cast %25 : vector<1x128x128xf32> to vector<128x128xf32>
    %cst_19 = arith.constant dense<0.000000e+00> : vector<256x128xf32>
    %27 = tpu.matmul %24, %26, %cst_19 {dimension_numbers = #tpu.dot_dimension_numbers<[1], [0], [0], [1], [0, 0, 1, 1], [], []>} : vector<256x128xf32>, vector<128x128xf32>, vector<256x128xf32> -> vector<256x128xf32>
    %28 = arith.addf %20, %27 : vector<256x128xf32>
    %29 = vector.extract_strided_slice %22 {offsets = [1, 0, 0], sizes = [16, 16, 128], strides = [1, 1, 1]} : vector<18x16x128xf32> to vector<16x16x128xf32>
    %30 = vector.shape_cast %29 : vector<16x16x128xf32> to vector<256x128xf32>
    %c4 = arith.constant 4 : index
    %c0_20 = arith.constant 0 : index
    %c0_21 = arith.constant 0 : index
    %31 = vector.load %arg2[%c4, %c0_20, %c0_21] : memref<9x128x128xf32, #tpu.memory_space<vmem>>, vector<1x128x128xf32>
    %32 = vector.shape_cast %31 : vector<1x128x128xf32> to vector<128x128xf32>
    %cst_22 = arith.constant dense<0.000000e+00> : vector<256x128xf32>
    %33 = tpu.matmul %30, %32, %cst_22 {dimension_numbers = #tpu.dot_dimension_numbers<[1], [0], [0], [1], [0, 0, 1, 1], [], []>} : vector<256x128xf32>, vector<128x128xf32>, vector<256x128xf32> -> vector<256x128xf32>
    %34 = arith.addf %28, %33 : vector<256x128xf32>
    %35 = vector.extract_strided_slice %22 {offsets = [2, 0, 0], sizes = [16, 16, 128], strides = [1, 1, 1]} : vector<18x16x128xf32> to vector<16x16x128xf32>
    %36 = vector.shape_cast %35 : vector<16x16x128xf32> to vector<256x128xf32>
    %c7 = arith.constant 7 : index
    %c0_23 = arith.constant 0 : index
    %c0_24 = arith.constant 0 : index
    %37 = vector.load %arg2[%c7, %c0_23, %c0_24] : memref<9x128x128xf32, #tpu.memory_space<vmem>>, vector<1x128x128xf32>
    %38 = vector.shape_cast %37 : vector<1x128x128xf32> to vector<128x128xf32>
    %cst_25 = arith.constant dense<0.000000e+00> : vector<256x128xf32>
    %39 = tpu.matmul %36, %38, %cst_25 {dimension_numbers = #tpu.dot_dimension_numbers<[1], [0], [0], [1], [0, 0, 1, 1], [], []>} : vector<256x128xf32>, vector<128x128xf32>, vector<256x128xf32> -> vector<256x128xf32>
    %40 = arith.addf %34, %39 : vector<256x128xf32>
    %c0_26 = arith.constant 0 : index
    %c0_27 = arith.constant 0 : index
    %c2 = arith.constant 2 : index
    %c0_28 = arith.constant 0 : index
    %41 = vector.load %arg1[%c0_26, %c0_27, %c2, %c0_28] : memref<1x18x18x128xf32, #tpu.memory_space<vmem>>, vector<1x18x16x128xf32>
    %42 = vector.shape_cast %41 : vector<1x18x16x128xf32> to vector<18x16x128xf32>
    %43 = vector.extract_strided_slice %42 {offsets = [0, 0, 0], sizes = [16, 16, 128], strides = [1, 1, 1]} : vector<18x16x128xf32> to vector<16x16x128xf32>
    %44 = vector.shape_cast %43 : vector<16x16x128xf32> to vector<256x128xf32>
    %c2_29 = arith.constant 2 : index
    %c0_30 = arith.constant 0 : index
    %c0_31 = arith.constant 0 : index
    %45 = vector.load %arg2[%c2_29, %c0_30, %c0_31] : memref<9x128x128xf32, #tpu.memory_space<vmem>>, vector<1x128x128xf32>
    %46 = vector.shape_cast %45 : vector<1x128x128xf32> to vector<128x128xf32>
    %cst_32 = arith.constant dense<0.000000e+00> : vector<256x128xf32>
    %47 = tpu.matmul %44, %46, %cst_32 {dimension_numbers = #tpu.dot_dimension_numbers<[1], [0], [0], [1], [0, 0, 1, 1], [], []>} : vector<256x128xf32>, vector<128x128xf32>, vector<256x128xf32> -> vector<256x128xf32>
    %48 = arith.addf %40, %47 : vector<256x128xf32>
    %49 = vector.extract_strided_slice %42 {offsets = [1, 0, 0], sizes = [16, 16, 128], strides = [1, 1, 1]} : vector<18x16x128xf32> to vector<16x16x128xf32>
    %50 = vector.shape_cast %49 : vector<16x16x128xf32> to vector<256x128xf32>
    %c5 = arith.constant 5 : index
    %c0_33 = arith.constant 0 : index
    %c0_34 = arith.constant 0 : index
    %51 = vector.load %arg2[%c5, %c0_33, %c0_34] : memref<9x128x128xf32, #tpu.memory_space<vmem>>, vector<1x128x128xf32>
    %52 = vector.shape_cast %51 : vector<1x128x128xf32> to vector<128x128xf32>
    %cst_35 = arith.constant dense<0.000000e+00> : vector<256x128xf32>
    %53 = tpu.matmul %50, %52, %cst_35 {dimension_numbers = #tpu.dot_dimension_numbers<[1], [0], [0], [1], [0, 0, 1, 1], [], []>} : vector<256x128xf32>, vector<128x128xf32>, vector<256x128xf32> -> vector<256x128xf32>
    %54 = arith.addf %48, %53 : vector<256x128xf32>
    %55 = vector.extract_strided_slice %42 {offsets = [2, 0, 0], sizes = [16, 16, 128], strides = [1, 1, 1]} : vector<18x16x128xf32> to vector<16x16x128xf32>
    %56 = vector.shape_cast %55 : vector<16x16x128xf32> to vector<256x128xf32>
    %c8 = arith.constant 8 : index
    %c0_36 = arith.constant 0 : index
    %c0_37 = arith.constant 0 : index
    %57 = vector.load %arg2[%c8, %c0_36, %c0_37] : memref<9x128x128xf32, #tpu.memory_space<vmem>>, vector<1x128x128xf32>
    %58 = vector.shape_cast %57 : vector<1x128x128xf32> to vector<128x128xf32>
    %cst_38 = arith.constant dense<0.000000e+00> : vector<256x128xf32>
    %59 = tpu.matmul %56, %58, %cst_38 {dimension_numbers = #tpu.dot_dimension_numbers<[1], [0], [0], [1], [0, 0, 1, 1], [], []>} : vector<256x128xf32>, vector<128x128xf32>, vector<256x128xf32> -> vector<256x128xf32>
    %60 = arith.addf %54, %59 : vector<256x128xf32>
    %c0_39 = arith.constant 0 : index
    %c0_40 = arith.constant 0 : index
    %61 = vector.load %arg3[%c0_39, %c0_40] : memref<1x128xf32, #tpu.memory_space<vmem>>, vector<1x128xf32>
    %62 = vector.broadcast %61 : vector<1x128xf32> to vector<256x128xf32>
    %63 = arith.addf %60, %62 : vector<256x128xf32>
    %c0_41 = arith.constant 0 : index
    %c0_42 = arith.constant 0 : index
    %c0_43 = arith.constant 0 : index
    %64 = vector.load %arg4[%c0_41, %c0_42, %c0_43] : memref<1x256x128xf32, #tpu.memory_space<vmem>>, vector<1x256x128xf32>
    %65 = vector.shape_cast %64 : vector<1x256x128xf32> to vector<256x128xf32>
    %66 = vector.shape_cast %63 : vector<256x128xf32> to vector<1x256x128xf32>
    tpu.vector_store %arg4[%c0_41, %c0_42, %c0_43], %66 {strides = array<i32>} : memref<1x256x128xf32, #tpu.memory_space<vmem>>, vector<1x256x128xf32>,
    return
  }
  func.func @transform_0(%arg0: i32) -> (i32, i32, i32, i32) {
    %c0_i32 = arith.constant 0 : i32
    %c0_i32_0 = arith.constant 0 : i32
    %c0_i32_1 = arith.constant 0 : i32
    %c0_i32_2 = arith.constant 0 : i32
    return %arg0, %c0_i32, %c0_i32_0, %c0_i32_1 : i32, i32, i32, i32
  }
  func.func @transform_1(%arg0: i32) -> (i32, i32, i32) {
    %c0_i32 = arith.constant 0 : i32
    %c0_i32_0 = arith.constant 0 : i32
    %c0_i32_1 = arith.constant 0 : i32
    %c0_i32_2 = arith.constant 0 : i32
    return %c0_i32, %c0_i32_0, %c0_i32_1 : i32, i32, i32
  }
  func.func @transform_2(%arg0: i32) -> (i32, i32) {
    %c0_i32 = arith.constant 0 : i32
    %c0_i32_0 = arith.constant 0 : i32
    %c0_i32_1 = arith.constant 0 : i32
    return %c0_i32, %c0_i32_0 : i32, i32
  }
  func.func @transform_3(%arg0: i32) -> (i32, i32, i32) {
    %c0_i32 = arith.constant 0 : i32
    %c0_i32_0 = arith.constant 0 : i32
    %c0_i32_1 = arith.constant 0 : i32
    return %arg0, %c0_i32, %c0_i32_0 : i32, i32, i32
  }
}

</mosaic_0001>

<bundles_post_ra>
// kernel: tpu_custom_call.1
= control target key start
LH: loop header
LB: loop body
LE: loop exit
PB: predicated region body
PF: predicated region fallthrough
CT: control target
= control target key end

     0   :  { %8 = vsyncpa [#allocation3], 0  ;;  %s6069_s0 = inlined_call_operand.vmem [shape: f32[2,18,18,128], index: 0, kind: input, shape index: {}]   ;;  %s6070_s1 = inlined_call_operand.vmem [shape: f32[9,128,128], index: 1, kind: input, shape index: {}]   ;;  %s6071_s2 = inlined_call_operand.vmem [shape: f32[1,128], index: 2, kind: input, shape index: {}]   ;;  %s6072_s3 = inlined_call_operand.hbm [shape: f32[2,256,128], index: 3, kind: output, shape index: {}]  }
   0x1   :  { %10 = vsyncpa [#allocation3 + $0x1], 0  ;;  %s4819_s12 = smov 0   ;;  %s4821_s13 = smov 0  }
   0x2   :  { %s4823_s14 = smov 0   ;;  %s4825_s15 = smov 0  }
   0x3 LB: > { %s4840_s16 = sadd.s32 4294967295, %s4794_s15   ;;  %s2825_s17 = sadd.s32 4294967294, %s4794_s15   ;;  %s4794_s15 = sphi %s4825_s15, %s6146_s15   ;;  %s4790_s14 = sphi %s4823_s14, %s6145_s14   ;;  %s4786_s13 = sphi %s4821_s13, %s6144_s13   ;;  %s4782_s12 = sphi %s4819_s12, %s6143_s12  }
   0x4   : > { %s4844_s18 = sadd.s32 1, %s4794_s15   ;;  %s91_s19 = sadd.s32 1, %s4790_s14 }
   0x5   : > { %s88_s20 = ssub.s32 %s4794_s15, %s4844_s18  ;;  %p101_p0 = scmp.ne.s32.totalorder %s4790_s14, %s4786_s13 }
   0x6   : > { %p89_p1 = scmp.eq.s32.totalorder %s88_s20, 0  ;;  %p102_p2 = scmp.eq.s32.totalorder %s4840_s16, 1 }
   0x7   : > { %p107_p3 = scmp.ne.s32.totalorder %s4786_s13, %s4782_s12  ;;  %p108_p4 = scmp.eq.s32.totalorder %s2825_s17, 1 }
   0x8   : > { %s4855_s21 = scalar_select %p89_p1, %s4790_s14, %s91_s19  }
   0x9   : > { %p4857_p5 = por %p102_p2, %p101_p0  ;;  %p4861_p6 = por %p108_p4, %p107_p3 }
   0xa   : > { %p2828_p7 = scmp.ge.s32.totalorder %s4794_s15, 1  ;;  %p140_p8 = scmp.lt.s32.totalorder %s4794_s15, 3 }
   0xc   : > { %p141_p9 = pnand %p2828_p7, %p140_p8 }
   0xe   : > { %144 = sbr.rel (%p141_p9) target bundleno = 573 (0x23d), region = 32 }
  0x15   : > { %v2831_v0 = vld [vmem:[%s6070_s1 + $0x180] sm:$0xff]  ;;  %v2832_v1 = vld [vmem:[%s6070_s1 + $0x188] sm:$0xff]  ;;  %p164_p10 = scmp.lt.s32.totalorder %s4840_s16, 1  ;;  %v2833_v5 = vld [vmem:[%s6070_s1 + $0x190] sm:$0xff]  ;;  %s2965_s30 = sshll.u32 %s4840_s16, 12 }
  0x16   : > { %v2879_v2 = vld [vmem:[%s6070_s1 + $0x200] sm:$0xff]  ;;  %v4118_v3 = vpack.c.bf16 %v2832_v1, %v2831_v0  ;;  %v2880_v4 = vld [vmem:[%s6070_s1 + $0x208] sm:$0xff]  ;;  %v2834_v6 = vld [vmem:[%s6070_s1 + $0x198] sm:$0xff]  ;;  %s6019_s7 = scalar_lea.hbm %s6072_s3, %s2965_s30  ;;  %s4796_s9 = smov [#allocation2]  }
  0x17   : > { %v4886_v7 = vpack.c.bf16 %v2880_v4, %v2879_v2  ;;  %v4122_v8 = vpack.c.bf16 %v2834_v6, %v2833_v5  ;;  %v2881_v9 = vld [vmem:[%s6070_s1 + $0x210] sm:$0xff]  ;;  %v2882_v10 = vld [vmem:[%s6070_s1 + $0x218] sm:$0xff]  ;;  %v2835_v11 = vld [vmem:[%s6070_s1 + $0x1a0] sm:$0xff]  ;;  %s165_s24 = scalar_select %p164_p10, %s4840_s16, 1 }
  0x18   : > { %4119 = vmatprep.subr.bf16.mxu1 %v4118_v3  ;;  %v4898_v12 = vpack.c.bf16 %v2882_v10, %v2881_v9  ;;  %v2836_v13 = vld [vmem:[%s6070_s1 + $0x1a8] sm:$0xff]  ;;  %v2883_v14 = vld [vmem:[%s6070_s1 + $0x220] sm:$0xff]  ;;  %v2837_v18 = vld [vmem:[%s6070_s1 + $0x1b0] sm:$0xff]  ;;  %s4736_s10 = sshll.u32 %s4796_s9, 4  ;;  %s4737_s10 = int_to_ptr.vmem [resolvable:$false] %s4736_s10 }
  0x19   : > { %v2884_v15 = vld [vmem:[%s6070_s1 + $0x228] sm:$0xff]  ;;  %4247 = vmatprep.subr.bf16.mxu0 %v4886_v7  ;;  %4121 = vmatpush3.bf16.msra.mxu1 %v4118_v3  ;;  %s4678_s4 = smul.u32 432, %s165_s24  ;;  %v4126_v16 = vpack.c.bf16 %v2836_v13, %v2835_v11  ;;  %v2838_v19 = vld [vmem:[%s6070_s1 + $0x1b8] sm:$0xff]  ;;  %v2885_v20 = vld [vmem:[%s6070_s1 + $0x230] sm:$0xff]  ;;  %s4738_s11 = scalar_lea.vmem %s4737_s10, 8192 }
  0x1a   : > { %4249 = vmatpush3.bf16.msra.mxu0 %v4886_v7  ;;  %4123 = vmatprep.subr.bf16.mxu1 %v4122_v8  ;;  %v4912_v17 = vpack.c.bf16 %v2884_v15, %v2883_v14  ;;  %v2886_v21 = vld [vmem:[%s6070_s1 + $0x238] sm:$0xff]  ;;  %v4130_v22 = vpack.c.bf16 %v2838_v19, %v2837_v18  ;;  %v2839_v24 = vld [vmem:[%s6070_s1 + $0x1c0] sm:$0xff]  ;;  %v2840_v25 = vld [vmem:[%s6070_s1 + $0x1c8] sm:$0xff] }
  0x1b   : > { %4251 = vmatprep.subr.bf16.mxu0 %v4898_v12  ;;  %s4929_s24 = scalar_lea.vmem %s6069_s0, %s4678_s4  ;;  %v4933_v23 = vpack.c.bf16 %v2886_v21, %v2885_v20  ;;  %v2887_v27 = vld [vmem:[%s6070_s1 + $0x240] sm:$0xff]  ;;  %v2888_v28 = vld [vmem:[%s6070_s1 + $0x248] sm:$0xff]  ;;  %v4134_v30 = vpack.c.bf16 %v2840_v25, %v2839_v24  ;;  %v2841_v32 = vld [vmem:[%s6070_s1 + $0x1d0] sm:$0xff] }
  0x1c   : > { %v4942_v26 = vld [vmem:[%s4929_s24 + $0x18] sm:$0xff]  ;;  %v4954_v31 = vpack.c.bf16 %v2888_v28, %v2887_v27  ;;  %v2889_v34 = vld [vmem:[%s6070_s1 + $0x250] sm:$0xff]  ;;  %v2843_v38 = vld [vmem:[%s6070_s1 + $0x1e0] sm:$0xff] }
  0x1d   : > { %4125 = vmatpush3.bf16.msra.mxu1 %v4122_v8  ;;  %3430 = vmatprep.mubr.f32.mxu1 %v4942_v26  ;;  %v964_v29 = vld [vmem:[%s4929_s24 + $0x19] sm:$0xff]  ;;  %v2844_v39 = vld [vmem:[%s6070_s1 + $0x1e8] sm:$0xff]  ;;  %v2845_v44 = vld [vmem:[%s6070_s1 + $0x1f0] sm:$0xff] }
  0x1e   : > { %4253 = vmatpush3.bf16.msra.mxu0 %v4898_v12  ;;  %4127 = vmatprep.subr.bf16.mxu1 %v4126_v16  ;;  %v2842_v33 = vld [vmem:[%s6070_s1 + $0x1d8] sm:$0xff]  ;;  %v2891_v40 = vld [vmem:[%s6070_s1 + $0x260] sm:$0xff]  ;;  %v2892_v41 = vld [vmem:[%s6070_s1 + $0x268] sm:$0xff]  ;;  %v4142_v42 = vpack.c.bf16 %v2844_v39, %v2843_v38 }
  0x1f   : > { %4255 = vmatprep.subr.bf16.mxu0 %v4912_v17  ;;  %3750 = vmatprep.mubr.f32.mxu0 %v964_v29  ;;  %v2890_v35 = vld [vmem:[%s6070_s1 + $0x258] sm:$0xff]  ;;  %v4138_v36 = vpack.c.bf16 %v2842_v33, %v2841_v32  ;;  %v4986_v43 = vpack.c.bf16 %v2892_v41, %v2891_v40  ;;  %v2893_v46 = vld [vmem:[%s6070_s1 + $0x270] sm:$0xff]  ;;  %v205_v50 = vld [vmem:[%s6070_s1] sm:$0xff] }
  0x20   : > { %v4970_v37 = vpack.c.bf16 %v2890_v35, %v2889_v34  ;;  %v2846_v45 = vld [vmem:[%s6070_s1 + $0x1f8] sm:$0xff]  ;;  %v206_v51 = vld [vmem:[%s6070_s1 + $0x8] sm:$0xff]  ;;  %v2895_v52 = vld [vmem:[%s6070_s1 + $0x380] sm:$0xff] }
  0x21   : > { %4129 = vmatpush3.bf16.msra.mxu1 %v4126_v16  ;;  %v2894_v47 = vld [vmem:[%s6070_s1 + $0x278] sm:$0xff]  ;;  %v4146_v48 = vpack.c.bf16 %v2846_v45, %v2845_v44  ;;  %v2896_v53 = vld [vmem:[%s6070_s1 + $0x388] sm:$0xff]  ;;  %v4150_v54 = vpack.c.bf16 %v206_v51, %v205_v50  ;;  %v2897_v56 = vld [vmem:[%s6070_s1 + $0x390] sm:$0xff] }
  0x22   : > { %4257 = vmatpush3.bf16.msra.mxu0 %v4912_v17  ;;  %4131 = vmatprep.subr.bf16.mxu1 %v4130_v22  ;;  %v5002_v49 = vpack.c.bf16 %v2894_v47, %v2893_v46  ;;  %v4278_v55 = vpack.c.bf16 %v2896_v53, %v2895_v52  ;;  %v2898_v57 = vld [vmem:[%s6070_s1 + $0x398] sm:$0xff]  ;;  %v5025_v58 = vld [vmem:[%s4929_s24 + $0x20] sm:$0xff]  ;;  %v207_v59 = vld [vmem:[%s6070_s1 + $0x10] sm:$0xff] }
  0x23   : > { %4259 = vmatprep.subr.bf16.mxu0 %v4933_v23  ;;  %v208_v60 = vld [vmem:[%s6070_s1 + $0x18] sm:$0xff]  ;;  %v965_v61 = vld [vmem:[%s4929_s24 + $0x21] sm:$0xff]  ;;  %v5036_v62 = vld [vmem:[%s4929_s24 + $0x30] sm:$0xff]  ;;  %v4282_v63 = vpack.c.bf16 %v2898_v57, %v2897_v56 }
  0x24   : > { %v5040_v0 = vld [vmem:[%s4929_s24 + $0x31] sm:$0xff]  ;;  %v4154_v1 = vpack.c.bf16 %v208_v60, %v207_v59  ;;  %v2899_v2 = vld [vmem:[%s6070_s1 + $0x3a0] sm:$0xff]  ;;  %v2900_v3 = vld [vmem:[%s6070_s1 + $0x3a8] sm:$0xff] }
  0x25   : > { %4133 = vmatpush3.bf16.msra.mxu1 %v4130_v22  ;;  %v5049_v4 = vld [vmem:[%s4929_s24 + $0x38] sm:$0xff]  ;;  %v209_v5 = vld [vmem:[%s6070_s1 + $0x20] sm:$0xff]  ;;  %v210_v6 = vld [vmem:[%s6070_s1 + $0x28] sm:$0xff]  ;;  %v4286_v11 = vpack.c.bf16 %v2900_v3, %v2899_v2 }
  0x26   : > { %4261 = vmatpush3.bf16.msra.mxu0 %v4933_v23  ;;  %4135 = vmatprep.subr.bf16.mxu1 %v4134_v30  ;;  %v5059_v8 = vld [vmem:[%s4929_s24 + $0x39] sm:$0xff]  ;;  %v5062_v9 = vld [vmem:[%s4929_s24 + $0x48] sm:$0xff]  ;;  %v2901_v13 = vld [vmem:[%s6070_s1 + $0x3b0] sm:$0xff]  ;;  %v4158_v15 = vpack.c.bf16 %v210_v6, %v209_v5 }
  0x27   : > { %4263 = vmatprep.subr.bf16.mxu0 %v4954_v31  ;;  %v5066_v10 = vld [vmem:[%s4929_s24 + $0x49] sm:$0xff]  ;;  %v2902_v14 = vld [vmem:[%s6070_s1 + $0x3b8] sm:$0xff]  ;;  %v5091_v21 = vld [vmem:[%s4929_s24 + $0x60] sm:$0xff] }
  0x28   : > { %v5078_v16 = vld [vmem:[%s4929_s24 + $0x50] sm:$0xff]  ;;  %v212_v19 = vld [vmem:[%s6070_s1 + $0x38] sm:$0xff]  ;;  %v5094_v22 = vld [vmem:[%s4929_s24 + $0x61] sm:$0xff]  ;;  %v4290_v24 = vpack.c.bf16 %v2902_v14, %v2901_v13 }
  0x29   : > { %4137 = vmatpush3.bf16.msra.mxu1 %v4134_v30  ;;  %v211_v18 = vld [vmem:[%s6070_s1 + $0x30] sm:$0xff]  ;;  %v2903_v25 = vld [vmem:[%s6070_s1 + $0x3c0] sm:$0xff]  ;;  %v2904_v27 = vld [vmem:[%s6070_s1 + $0x3c8] sm:$0xff] }
  0x2a   : > { %4265 = vmatpush3.bf16.msra.mxu0 %v4954_v31  ;;  %4139 = vmatprep.subr.bf16.mxu1 %v4138_v36  ;;  %v5088_v20 = vld [vmem:[%s4929_s24 + $0x51] sm:$0xff]  ;;  %v4162_v28 = vpack.c.bf16 %v212_v19, %v211_v18  ;;  %v5106_v29 = vld [vmem:[%s4929_s24 + $0x68] sm:$0xff]  ;;  %v213_v30 = vld [vmem:[%s6070_s1 + $0x40] sm:$0xff] }
  0x2b   : > { %4267 = vmatprep.subr.bf16.mxu0 %v4970_v37  ;;  %v214_v32 = vld [vmem:[%s6070_s1 + $0x48] sm:$0xff]  ;;  %v5119_v34 = vld [vmem:[%s4929_s24 + $0x78] sm:$0xff]  ;;  %v2905_v38 = vld [vmem:[%s6070_s1 + $0x3d0] sm:$0xff] }
  0x2c   : > { %v5116_v33 = vld [vmem:[%s4929_s24 + $0x69] sm:$0xff]  ;;  %v5122_v35 = vld [vmem:[%s4929_s24 + $0x79] sm:$0xff]  ;;  %v4166_v40 = vpack.c.bf16 %v214_v32, %v213_v30  ;;  %v5144_v45 = vld [vmem:[%s4929_s24 + $0x81] sm:$0xff] }
  0x2d   : > { %4141 = vmatpush3.bf16.msra.mxu1 %v4138_v36  ;;  %v4294_v36 = vpack.c.bf16 %v2904_v27, %v2903_v25  ;;  %v2906_v39 = vld [vmem:[%s6070_s1 + $0x3d8] sm:$0xff]  ;;  %v5134_v41 = vld [vmem:[%s4929_s24 + $0x80] sm:$0xff]  ;;  %v5147_v46 = vld [vmem:[%s4929_s24 + $0x90] sm:$0xff] }
  0x2e   : > { %4269 = vmatpush3.bf16.msra.mxu0 %v4970_v37  ;;  %4143 = vmatprep.subr.bf16.mxu1 %v4142_v42  ;;  %v216_v44 = vld [vmem:[%s6070_s1 + $0x58] sm:$0xff]  ;;  %v2907_v50 = vld [vmem:[%s6070_s1 + $0x3e0] sm:$0xff]  ;;  %v2908_v51 = vld [vmem:[%s6070_s1 + $0x3e8] sm:$0xff] }
  0x2f   : > { %4271 = vmatprep.subr.bf16.mxu0 %v4986_v43  ;;  %v5150_v47 = vld [vmem:[%s4929_s24 + $0x91] sm:$0xff]  ;;  %v5172_v56 = vld [vmem:[%s4929_s24 + $0x99] sm:$0xff]  ;;  %v5175_v57 = vld [vmem:[%s4929_s24 + $0xa8] sm:$0xff]  ;;  %v4302_v60 = vpack.c.bf16 %v2908_v51, %v2907_v50 }
  0x30   : > { %v5162_v53 = vld [vmem:[%s4929_s24 + $0x98] sm:$0xff]  ;;  %v5178_v59 = vld [vmem:[%s4929_s24 + $0xa9] sm:$0xff]  ;;  %v5206_v13 = vld [vmem:[%s4929_s24 + $0xc1] sm:$0xff] }
  0x31   : > { %4145 = vmatpush3.bf16.msra.mxu1 %v4142_v42  ;;  %v215_v42 = vld [vmem:[%s6070_s1 + $0x50] sm:$0xff]  ;;  %v220_v5 = vld [vmem:[%s6070_s1 + $0x78] sm:$0xff]  ;;  %6107 = vst [vmem:[#allocation5_spill] sm:$0xff] %v5206_v13  ;;  %v2912_v18 = vld [vmem:[%s6070_s1 + $0x108] sm:$0xff] }
  0x32   : > { %4273 = vmatpush3.bf16.msra.mxu0 %v4986_v43  ;;  %4147 = vmatprep.subr.bf16.mxu1 %v4146_v48  ;;  %v4170_v52 = vpack.c.bf16 %v216_v44, %v215_v42  ;;  %v5190_v2 = vld [vmem:[%s4929_s24 + $0xb0] sm:$0xff]  ;;  %v2847_v25 = vld [vmem:[%s6070_s1 + $0x300] sm:$0xff]  ;;  %v2848_v27 = vld [vmem:[%s6070_s1 + $0x308] sm:$0xff] }
  0x33   : > { %4275 = vmatprep.subr.bf16.mxu0 %v5002_v49  ;;  %v219_v3 = vld [vmem:[%s6070_s1 + $0x70] sm:$0xff]  ;;  %v5231_v30 = vld [vmem:[%s4929_s24 + $0xd8] sm:$0xff]  ;;  %v2916_v50 = vld [vmem:[%s6070_s1 + $0x128] sm:$0xff] }
  0x34   : > { %v5200_v6 = vld [vmem:[%s4929_s24 + $0xb1] sm:$0xff]  ;;  %v4178_v19 = vpack.c.bf16 %v220_v5, %v219_v3  ;;  %v5266_v51 = vld [vmem:[%s4929_s24 + $0x108] sm:$0xff] }
  0x35   : > { %4149 = vmatpush3.bf16.msra.mxu1 %v4146_v48  ;;  %v4298_v48 = vpack.c.bf16 %v2906_v39, %v2905_v38  ;;  %v2914_v38 = vld [vmem:[%s6070_s1 + $0x118] sm:$0xff]  ;;  %v5240_v39 = vpack.c.bf16 %v2848_v27, %v2847_v25  ;;  %v5249_v42 = vld [vmem:[%s4929_s24 + $0xf0] sm:$0xff] }
  0x36   : > { %4277 = vmatpush3.bf16.msra.mxu0 %v5002_v49  ;;  %4151 = vmatprep.subr.bf16.mxu1 %v4150_v54  ;;  %v2921_v3 = vld [vmem:[%s6070_s1 + $0x150] sm:$0xff] }
  0x37   : > { %4279 = vmatprep.subr.bf16.mxu0 %v4278_v55  ;;  %v5314_v5 = vld [vmem:[%s4929_s24 + $0x150] sm:$0xff] }
  0x38   : > { %3431 = vmatmul.mubr.f32.vlgmr.msra.gmra.mrb[0].mxu1 %v5025_v58  ;;  %v2925_v25 = vld [vmem:[%s6070_s1 + $0x170] sm:$0xff] }
  0x39   : > { %3751 = vmatmul.mubr.f32.vlgmr.msra.gmra.mrb[0].mxu0 %v965_v61  ;;  %4153 = vmatpush3.bf16.msra.mxu1 %v4150_v54  ;;  %v217_v54 = vld [vmem:[%s6070_s1 + $0x60] sm:$0xff]  ;;  %v2909_v61 = vld [vmem:[%s6070_s1 + $0x3f0] sm:$0xff] }
  0x3a   : > { %4281 = vmatpush3.bf16.msra.mxu0 %v4278_v55  ;;  %3433 = vmatprep.mubr.f32.mxu1 %v5036_v62  ;;  %v218_v55 = vld [vmem:[%s6070_s1 + $0x68] sm:$0xff]  ;;  %v5342_v27 = vld [vmem:[%s4929_s24 + $0x170] sm:$0xff] }
  0x3b   : > { %3753 = vmatprep.mubr.f32.mxu0 %v5040_v0  ;;  %4283 = vmatprep.subr.bf16.mxu0 %v4282_v63 }
  0x3c   : > { %3434 = vmatmul.mubr.f32.gmra.mrb[2].mxu1 %v5049_v4  ;;  %4155 = vmatprep.subr.bf16.mxu1 %v4154_v1 }
  0x3d   : > { %3754 = vmatmul.mubr.f32.gmra.mrb[2].mxu0 %v5059_v8  ;;  %3436 = vmatprep.mubr.f32.mxu1 %v5062_v9 }
  0x3e   : > { %4285 = vmatpush3.bf16.msra.mxu0 %v4282_v63  ;;  %3756 = vmatprep.mubr.f32.mxu0 %v5066_v10  ;;  %v2910_v63 = vld [vmem:[%s6070_s1 + $0x3f8] sm:$0xff] }
  0x3f   : > { %4287 = vmatprep.subr.bf16.mxu0 %v4286_v11  ;;  %4157 = vmatpush3.bf16.msra.mxu1 %v4154_v1  ;;  %v4174_v1 = vpack.c.bf16 %v218_v55, %v217_v54  ;;  %v4306_v14 = vpack.c.bf16 %v2910_v63, %v2909_v61  ;;  %v2917_v54 = vld [vmem:[%s6070_s1 + $0x130] sm:$0xff]  ;;  %v5282_v55 = vld [vmem:[%s4929_s24 + $0x120] sm:$0xff]  ;;  %v5298_v63 = vld [vmem:[%s4929_s24 + $0x138] sm:$0xff] }
  0x40   : > { %3437 = vmatmul.mubr.f32.gmra.mrb[4].mxu1 %v5078_v16  ;;  %4159 = vmatprep.subr.bf16.mxu1 %v4158_v15  ;;  %v2919_v61 = vld [vmem:[%s6070_s1 + $0x140] sm:$0xff] }
  0x41   : > { %3757 = vmatmul.mubr.f32.gmra.mrb[4].mxu0 %v5088_v20  ;;  %3439 = vmatprep.mubr.f32.mxu1 %v5091_v21 }
  0x42   : > { %4289 = vmatpush3.bf16.msra.mxu0 %v4286_v11  ;;  %3759 = vmatprep.mubr.f32.mxu0 %v5094_v22  ;;  %v5203_v11 = vld [vmem:[%s4929_s24 + $0xc0] sm:$0xff] }
  0x43   : > { %4291 = vmatprep.subr.bf16.mxu0 %v4290_v24  ;;  %4161 = vmatpush3.bf16.msra.mxu1 %v4158_v15  ;;  %v2911_v15 = vld [vmem:[%s6070_s1 + $0x100] sm:$0xff] }
  0x44   : > { %3440 = vmatmul.mubr.f32.gmra.mrb[6].mxu1 %v5106_v29  ;;  %4163 = vmatprep.subr.bf16.mxu1 %v4162_v28  ;;  %v4310_v32 = vpack.c.bf16 %v2912_v18, %v2911_v15  ;;  %v2923_v15 = vld [vmem:[%s6070_s1 + $0x160] sm:$0xff]  ;;  %v5330_v18 = vld [vmem:[%s4929_s24 + $0x168] sm:$0xff] }
  0x45   : > { %3760 = vmatmul.mubr.f32.gmra.mrb[6].mxu0 %v5116_v33  ;;  %3442 = vmatprep.mubr.f32.mxu1 %v5119_v34 }
  0x46   : > { %4293 = vmatpush3.bf16.msra.mxu0 %v4290_v24  ;;  %3762 = vmatprep.mubr.f32.mxu0 %v5122_v35  ;;  %v5218_v24 = vld [vmem:[%s4929_s24 + $0xc8] sm:$0xff] }
  0x47   : > { %4295 = vmatprep.subr.bf16.mxu0 %v4294_v36  ;;  %4165 = vmatpush3.bf16.msra.mxu1 %v4162_v28  ;;  %v5228_v28 = vld [vmem:[%s4929_s24 + $0xc9] sm:$0xff] }
  0x48   : > { %3443 = vmatmul.mubr.f32.gmra.mrb[8].mxu1 %v5134_v41  ;;  %4167 = vmatprep.subr.bf16.mxu1 %v4166_v40  ;;  %6108 = vst [vmem:[#allocation6_spill] sm:$0xff] %v5228_v28 }
  0x49   : > { %3763 = vmatmul.mubr.f32.gmra.mrb[8].mxu0 %v5144_v45  ;;  %3445 = vmatprep.mubr.f32.mxu1 %v5147_v46 }
  0x4a   : > { %4297 = vmatpush3.bf16.msra.mxu0 %v4294_v36  ;;  %3765 = vmatprep.mubr.f32.mxu0 %v5150_v47  ;;  %v2913_v36 = vld [vmem:[%s6070_s1 + $0x110] sm:$0xff] }
  0x4b   : > { %4299 = vmatprep.subr.bf16.mxu0 %v4298_v48  ;;  %4169 = vmatpush3.bf16.msra.mxu1 %v4166_v40  ;;  %v5245_v40 = vld [vmem:[%s4929_s24 + $0xe0] sm:$0xff]  ;;  %v4314_v44 = vpack.c.bf16 %v2914_v38, %v2913_v36 }
  0x4c   : > { %3446 = vmatmul.mubr.f32.gmra.mrb[10].mxu1 %v5162_v53  ;;  %4171 = vmatprep.subr.bf16.mxu1 %v4170_v52  ;;  %v5349_v36 = vld [vmem:[%s4929_s24 + $0xd9] sm:$0xff] }
  0x4d   : > { %3766 = vmatmul.mubr.f32.gmra.mrb[10].mxu0 %v5172_v56  ;;  %3448 = vmatprep.mubr.f32.mxu1 %v5175_v57  ;;  %6109 = vst [vmem:[#allocation7_spill] sm:$0xff] %v5349_v36 }
  0x4e   : > { %4301 = vmatpush3.bf16.msra.mxu0 %v4298_v48  ;;  %3768 = vmatprep.mubr.f32.mxu0 %v5178_v59  ;;  %v2915_v48 = vld [vmem:[%s6070_s1 + $0x120] sm:$0xff] }
  0x4f   : > { %4303 = vmatprep.subr.bf16.mxu0 %v4302_v60  ;;  %4173 = vmatpush3.bf16.msra.mxu1 %v4170_v52  ;;  %v4318_v52 = vpack.c.bf16 %v2916_v50, %v2915_v48  ;;  %v2928_v48 = vld [vmem:[%s6070_s1 + $0x288] sm:$0xff] }
  0x50   : > { %3449 = vmatmul.mubr.f32.gmra.mrb[12].mxu1 %v5190_v2  ;;  %4175 = vmatprep.subr.bf16.mxu1 %v4174_v1  ;;  %v5361_v50 = vld [vmem:[%s4929_s24 + $0x188] sm:$0xff] }
  0x51   : > { %3769 = vmatmul.mubr.f32.gmra.mrb[12].mxu0 %v5200_v6  ;;  %3451 = vmatprep.mubr.f32.mxu1 %v5203_v11 }
  0x52   : > { %4305 = vmatpush3.bf16.msra.mxu0 %v4302_v60  ;;  %3771 = vmatprep.mubr.f32.mxu0 %v5206_v13 }
  0x53   : > { %4307 = vmatprep.subr.bf16.mxu0 %v4306_v14  ;;  %4177 = vmatpush3.bf16.msra.mxu1 %v4174_v1 }
  0x54   : > { %3452 = vmatmul.mubr.f32.gmra.mrb[14].mxu1 %v5218_v24  ;;  %4179 = vmatprep.subr.bf16.mxu1 %v4178_v19 }
  0x55   : > { %3772 = vmatmul.mubr.f32.gmra.mrb[14].mxu0 %v5228_v28  ;;  %3454 = vmatprep.mubr.f32.mxu1 %v5231_v30 }
  0x56   : > { %4309 = vmatpush3.bf16.msra.mxu0 %v4306_v14  ;;  %3830 = vmatprep.mubr.f32.mxu0 %v5040_v0  ;;  %v5262_v0 = vld [vmem:[%s4929_s24 + $0xf8] sm:$0xff] }
  0x57   : > { %4311 = vmatprep.subr.bf16.mxu0 %v4310_v32  ;;  %4181 = vmatpush3.bf16.msra.mxu1 %v4178_v19 }
  0x58   : > { %3455 = vmatmul.mubr.f32.gmra.mrb[16].mxu1 %v5245_v40  ;;  %4183 = vmatprep.subr.bf16.mxu1 %v5240_v39 }
  0x59   : > { %3831 = vmatmul.mubr.f32.vlgmr.msra.gmra.mrb[0].mxu0 %v5059_v8  ;;  %3457 = vmatprep.mubr.f32.mxu1 %v5249_v42  ;;  %v2918_v8 = vld [vmem:[%s6070_s1 + $0x138] sm:$0xff] }
  0x5a   : > { %4313 = vmatpush3.bf16.msra.mxu0 %v4310_v32  ;;  %3833 = vmatprep.mubr.f32.mxu0 %v5066_v10  ;;  %v5278_v10 = vld [vmem:[%s4929_s24 + $0x110] sm:$0xff]  ;;  %v4322_v60 = vpack.c.bf16 %v2918_v8, %v2917_v54  ;;  %v5346_v32 = vld [vmem:[%s4929_s24 + $0x180] sm:$0xff] }
  0x5b   : > { %4315 = vmatprep.subr.bf16.mxu0 %v4314_v44  ;;  %v169_v54 = vld [vmem:[%s4929_s24] sm:$0xff]  ;;  %v5369_v8 = vld [vmem:[%s4929_s24 + $0xf1] sm:$0xff] }
  0x5c   : > { %3458 = vmatmul.mubr.f32.gmra.mrb[18].mxu1 %v5262_v0  ;;  %6111 = vst [vmem:[#allocation9_spill] sm:$0xff] %v5369_v8 }
  0x5d   : > { %3834 = vmatmul.mubr.f32.gmra.mrb[2].mxu0 %v5088_v20  ;;  %3460 = vmatprep.mubr.f32.mxu1 %v5266_v51  ;;  %v2920_v20 = vld [vmem:[%s6070_s1 + $0x148] sm:$0xff] }
  0x5e   : > { %3836 = vmatprep.mubr.f32.mxu0 %v5094_v22  ;;  %4317 = vmatpush3.bf16.msra.mxu0 %v4314_v44  ;;  %v5294_v22 = vld [vmem:[%s4929_s24 + $0x128] sm:$0xff]  ;;  %v4326_v1 = vpack.c.bf16 %v2920_v20, %v2919_v61  ;;  %v2927_v44 = vld [vmem:[%s6070_s1 + $0x280] sm:$0xff]  ;;  %v2849_v61 = vld [vmem:[%s6070_s1 + $0x310] sm:$0xff] }
  0x5f   : > { %4319 = vmatprep.subr.bf16.mxu0 %v4318_v52  ;;  %v2850_v20 = vld [vmem:[%s6070_s1 + $0x318] sm:$0xff] }
  0x60   : > { %3461 = vmatmul.mubr.f32.gmra.mrb[20].mxu1 %v5278_v10 }
  0x61   : > { %3837 = vmatmul.mubr.f32.gmra.mrb[4].mxu0 %v5116_v33  ;;  %3463 = vmatprep.mubr.f32.mxu1 %v5282_v55  ;;  %v2922_v33 = vld [vmem:[%s6070_s1 + $0x158] sm:$0xff] }
  0x62   : > { %3839 = vmatprep.mubr.f32.mxu0 %v5122_v35  ;;  %4321 = vmatpush3.bf16.msra.mxu0 %v4318_v52  ;;  %v5310_v35 = vld [vmem:[%s4929_s24 + $0x140] sm:$0xff]  ;;  %v4330_v14 = vpack.c.bf16 %v2922_v33, %v2921_v3  ;;  %v5387_v33 = vld [vmem:[%s4929_s24 + $0x109] sm:$0xff] }
  0x63   : > { %4323 = vmatprep.subr.bf16.mxu0 %v4322_v60  ;;  %v5365_v52 = vld [vmem:[%s4929_s24 + $0xe1] sm:$0xff]  ;;  %v5384_v3 = vld [vmem:[%s4929_s24 + $0xf9] sm:$0xff]  ;;  %6113 = vst [vmem:[#allocation11_spill] sm:$0xff] %v5387_v33 }
  0x64   : > { %3464 = vmatmul.mubr.f32.gmra.mrb[22].mxu1 %v5294_v22  ;;  %6110 = vst [vmem:[#allocation8_spill] sm:$0xff] %v5365_v52  ;;  %6112 = vst [vmem:[#allocation10_spill] sm:$0xff] %v5384_v3 }
  0x65   : > { %3840 = vmatmul.mubr.f32.gmra.mrb[6].mxu0 %v5144_v45  ;;  %3466 = vmatprep.mubr.f32.mxu1 %v5298_v63  ;;  %v2924_v45 = vld [vmem:[%s6070_s1 + $0x168] sm:$0xff] }
  0x66   : > { %3842 = vmatprep.mubr.f32.mxu0 %v5150_v47  ;;  %4325 = vmatpush3.bf16.msra.mxu0 %v4322_v60  ;;  %v5326_v47 = vld [vmem:[%s4929_s24 + $0x158] sm:$0xff]  ;;  %v4334_v19 = vpack.c.bf16 %v2924_v45, %v2923_v15  ;;  %v5371_v60 = vpack.c.bf16 %v2928_v48, %v2927_v44  ;;  %v2851_v15 = vld [vmem:[%s6070_s1 + $0x320] sm:$0xff]  ;;  %v2852_v45 = vld [vmem:[%s6070_s1 + $0x328] sm:$0xff] }
  0x67   : > { %4327 = vmatprep.subr.bf16.mxu0 %v4326_v1  ;;  %v2855_v48 = vld [vmem:[%s6070_s1 + $0x340] sm:$0xff] }
  0x68   : > { %3467 = vmatmul.mubr.f32.gmra.mrb[24].mxu1 %v5310_v35 }
  0x69   : > { %3843 = vmatmul.mubr.f32.gmra.mrb[8].mxu0 %v5172_v56  ;;  %3469 = vmatprep.mubr.f32.mxu1 %v5314_v5  ;;  %v2926_v56 = vld [vmem:[%s6070_s1 + $0x178] sm:$0xff] }
  0x6a   : > { %3845 = vmatprep.mubr.f32.mxu0 %v5178_v59  ;;  %4329 = vmatpush3.bf16.msra.mxu0 %v4326_v1  ;;  %v4338_v38 = vpack.c.bf16 %v2926_v56, %v2925_v25  ;;  %v170_v1 = vld [vmem:[%s4929_s24 + $0x8] sm:$0xff]  ;;  %v4190_v56 = vpack.c.bf16 %v2852_v45, %v2851_v15  ;;  %v2858_v15 = vld [vmem:[%s6070_s1 + $0x358] sm:$0xff] }
  0x6b   : > { %4331 = vmatprep.subr.bf16.mxu0 %v4330_v14  ;;  %v5404_v25 = vld [vmem:[%s4929_s24 + $0x121] sm:$0xff]  ;;  %v5449_v45 = vld [vmem:[%s4929_s24 + $0x159] sm:$0xff] }
  0x6c   : > { %3470 = vmatmul.mubr.f32.gmra.mrb[26].mxu1 %v5326_v47  ;;  %6115 = vst [vmem:[#allocation13_spill] sm:$0xff] %v5404_v25  ;;  %6120 = vst [vmem:[#allocation18_spill] sm:$0xff] %v5449_v45 }
  0x6d   : > { %3846 = vmatmul.mubr.f32.gmra.mrb[10].mxu0 %v5200_v6  ;;  %3472 = vmatprep.mubr.f32.mxu1 %v5330_v18 }
  0x6e   : > { %3848 = vmatprep.mubr.f32.mxu0 %v5206_v13  ;;  %4333 = vmatpush3.bf16.msra.mxu0 %v4330_v14  ;;  %v4186_v14 = vpack.c.bf16 %v2850_v20, %v2849_v61  ;;  %v5433_v61 = vld [vmem:[%s4929_s24 + $0x141] sm:$0xff]  ;;  %v5436_v20 = vld [vmem:[%s4929_s24 + $0x151] sm:$0xff] }
  0x6f   : > { %4335 = vmatprep.subr.bf16.mxu0 %v4334_v19  ;;  %6118 = vst [vmem:[#allocation16_spill] sm:$0xff] %v5433_v61  ;;  %6119 = vst [vmem:[#allocation17_spill] sm:$0xff] %v5436_v20  ;;  %v2867_v13 = vld [vmem:[%s6070_s1 + $0xa0] sm:$0xff] }
  0x70   : > { %3473 = vmatmul.mubr.f32.gmra.mrb[28].mxu1 %v5342_v27 }
  0x71   : > { %3849 = vmatmul.mubr.f32.gmra.mrb[12].mxu0 %v5228_v28  ;;  %3475 = vmatprep.mubr.f32.mxu1 %v5346_v32  ;;  %v2866_v28 = vld [vmem:[%s6070_s1 + $0x98] sm:$0xff] }
  0x72   : > { %3851 = vmatprep.mubr.f32.mxu0 %v5349_v36  ;;  %4337 = vmatpush3.bf16.msra.mxu0 %v4334_v19  ;;  %v5401_v19 = vld [vmem:[%s4929_s24 + $0x111] sm:$0xff] }
  0x73   : > { %4339 = vmatprep.subr.bf16.mxu0 %v4338_v38  ;;  %6114 = vst [vmem:[#allocation12_spill] sm:$0xff] %v5401_v19  ;;  %v2865_v36 = vld [vmem:[%s6070_s1 + $0x90] sm:$0xff] }
  0x74   : > { %3476 = vmatmul.mubr.f32.gmra.mrb[30].mxu1 %v5361_v50 }
  0x75   : > { %3852 = vmatmul.mubr.f32.gmra.mrb[14].mxu0 %v5365_v52  ;;  %3510 = vmatprep.mubr.f32.mxu1 %v169_v54  ;;  %v2856_v54 = vld [vmem:[%s6070_s1 + $0x348] sm:$0xff] }
  0x76   : > { %3854 = vmatprep.mubr.f32.mxu0 %v5369_v8  ;;  %4341 = vmatpush3.bf16.msra.mxu0 %v4338_v38  ;;  %v2853_v38 = vld [vmem:[%s6070_s1 + $0x330] sm:$0xff]  ;;  %v2943_v8 = vld [vmem:[%s6070_s1 + $0x400] sm:$0xff]  ;;  %v2944_v52 = vld [vmem:[%s6070_s1 + $0x408] sm:$0xff] }
  0x77   : > { %4343 = vmatprep.subr.bf16.mxu0 %v5371_v60 }
  0x78   : > { %3511 = vmatmul.mubr.f32.vlgmr.msra.gmra.mrb[0].mxu1 %v170_v1  ;;  %v4198_v1 = vpack.c.bf16 %v2856_v54, %v2855_v48  ;;  %v2860_v48 = vld [vmem:[%s6070_s1 + $0x368] sm:$0xff] }
  0x79   : > { %3855 = vmatmul.mubr.f32.gmra.mrb[16].mxu0 %v5384_v3  ;;  %4185 = vmatpush3.bf16.msra.mxu1 %v5240_v39  ;;  %v2854_v39 = vld [vmem:[%s6070_s1 + $0x338] sm:$0xff]  ;;  %v5468_v54 = vld [vmem:[%s4929_s24 + $0x181] sm:$0xff] }
  0x7a   : > { %3513 = vmatprep.mubr.f32.mxu1 %v4942_v26  ;;  %3857 = vmatprep.mubr.f32.mxu0 %v5387_v33  ;;  %v5417_v26 = vld [vmem:[%s4929_s24 + $0x129] sm:$0xff]  ;;  %v4194_v44 = vpack.c.bf16 %v2854_v39, %v2853_v38  ;;  %v2859_v39 = vld [vmem:[%s6070_s1 + $0x360] sm:$0xff]  ;;  %6123 = vst [vmem:[#allocation21_spill] sm:$0xff] %v5468_v54  ;;  %v2942_v3 = vld [vmem:[%s6070_s1 + $0x2f8] sm:$0xff] }
  0x7b   : > { %4187 = vmatprep.subr.bf16.mxu1 %v4186_v14  ;;  %6116 = vst [vmem:[#allocation14_spill] sm:$0xff] %v5417_v26  ;;  %v2941_v33 = vld [vmem:[%s6070_s1 + $0x2f0] sm:$0xff] }
  0x7c   : > { %3514 = vmatmul.mubr.f32.gmra.mrb[2].mxu1 %v5025_v58  ;;  %v5420_v58 = vld [vmem:[%s4929_s24 + $0x139] sm:$0xff] }
  0x7d   : > { %3858 = vmatmul.mubr.f32.gmra.mrb[18].mxu0 %v5401_v19  ;;  %3516 = vmatprep.mubr.f32.mxu1 %v5036_v62  ;;  %6117 = vst [vmem:[#allocation15_spill] sm:$0xff] %v5420_v58  ;;  %v2940_v19 = vld [vmem:[%s6070_s1 + $0x2e8] sm:$0xff] }
  0x7e   : > { %3860 = vmatprep.mubr.f32.mxu0 %v5404_v25  ;;  %4189 = vmatpush3.bf16.msra.mxu1 %v4186_v14  ;;  %v2857_v14 = vld [vmem:[%s6070_s1 + $0x350] sm:$0xff]  ;;  %v2939_v25 = vld [vmem:[%s6070_s1 + $0x2e0] sm:$0xff] }
  0x7f   : > { %4191 = vmatprep.subr.bf16.mxu1 %v4190_v56  ;;  %v4202_v38 = vpack.c.bf16 %v2858_v15, %v2857_v14  ;;  %v4206_v14 = vpack.c.bf16 %v2860_v48, %v2859_v39  ;;  %v2861_v15 = vld [vmem:[%s6070_s1 + $0x370] sm:$0xff]  ;;  %v996_v39 = vld [vmem:[%s4929_s24 + $0x199] sm:$0xff] }
  0x80   : > { %3517 = vmatmul.mubr.f32.gmra.mrb[4].mxu1 %v5049_v4 }
  0x81   : > { %3861 = vmatmul.mubr.f32.gmra.mrb[20].mxu0 %v5417_v26  ;;  %3519 = vmatprep.mubr.f32.mxu1 %v5062_v9  ;;  %v2938_v26 = vld [vmem:[%s6070_s1 + $0x2d8] sm:$0xff] }
  0x82   : > { %3863 = vmatprep.mubr.f32.mxu0 %v5420_v58  ;;  %4193 = vmatpush3.bf16.msra.mxu1 %v4190_v56  ;;  %v5452_v56 = vld [vmem:[%s4929_s24 + $0x169] sm:$0xff] }
  0x83   : > { %4195 = vmatprep.subr.bf16.mxu1 %v4194_v44  ;;  %6121 = vst [vmem:[#allocation19_spill] sm:$0xff] %v5452_v56  ;;  %v2937_v58 = vld [vmem:[%s6070_s1 + $0x2d0] sm:$0xff] }
  0x84   : > { %3520 = vmatmul.mubr.f32.gmra.mrb[6].mxu1 %v5078_v16 }
  0x85   : > { %3864 = vmatmul.mubr.f32.gmra.mrb[22].mxu0 %v5433_v61  ;;  %3522 = vmatprep.mubr.f32.mxu1 %v5091_v21  ;;  %v2936_v61 = vld [vmem:[%s6070_s1 + $0x2c8] sm:$0xff] }
  0x86   : > { %3866 = vmatprep.mubr.f32.mxu0 %v5436_v20  ;;  %4197 = vmatpush3.bf16.msra.mxu1 %v4194_v44  ;;  %v5465_v44 = vld [vmem:[%s4929_s24 + $0x171] sm:$0xff]  ;;  %v2935_v20 = vld [vmem:[%s6070_s1 + $0x2c0] sm:$0xff] }
  0x87   : > { %4199 = vmatprep.subr.bf16.mxu1 %v4198_v1  ;;  %6122 = vst [vmem:[#allocation20_spill] sm:$0xff] %v5465_v44 }
  0x88   : > { %3523 = vmatmul.mubr.f32.gmra.mrb[8].mxu1 %v5106_v29 }
  0x89   : > { %3867 = vmatmul.mubr.f32.gmra.mrb[24].mxu0 %v5449_v45  ;;  %3525 = vmatprep.mubr.f32.mxu1 %v5119_v34  ;;  %v2862_v45 = vld [vmem:[%s6070_s1 + $0x378] sm:$0xff] }
  0x8a   : > { %3869 = vmatprep.mubr.f32.mxu0 %v5452_v56  ;;  %4201 = vmatpush3.bf16.msra.mxu1 %v4198_v1  ;;  %v5481_v1 = vld [vmem:[%s4929_s24 + $0x189] sm:$0xff]  ;;  %v4210_v48 = vpack.c.bf16 %v2862_v45, %v2861_v15  ;;  %v2863_v56 = vld [vmem:[%s6070_s1 + $0x80] sm:$0xff] }
  0x8b   : > { %4203 = vmatprep.subr.bf16.mxu1 %v4202_v38  ;;  %6124 = vst [vmem:[#allocation22_spill] sm:$0xff] %v5481_v1  ;;  %v1820_v45 = vld [vmem:[%s4929_s24 + $0x2] sm:$0xff] }
  0x8c   : > { %3526 = vmatmul.mubr.f32.gmra.mrb[10].mxu1 %v5134_v41 }
  0x8d   : > { %3870 = vmatmul.mubr.f32.gmra.mrb[26].mxu0 %v5465_v44  ;;  %3528 = vmatprep.mubr.f32.mxu1 %v5147_v46  ;;  %v2864_v44 = vld [vmem:[%s6070_s1 + $0x88] sm:$0xff] }
  0x8e   : > { %3872 = vmatprep.mubr.f32.mxu0 %v5468_v54  ;;  %4205 = vmatpush3.bf16.msra.mxu1 %v4202_v38  ;;  %v997_v38 = vld [vmem:[%s4929_s24 + $0x1a1] sm:$0xff]  ;;  %v5495_v15 = vpack.c.bf16 %v2864_v44, %v2863_v56  ;;  %v2929_v54 = vld [vmem:[%s6070_s1 + $0x290] sm:$0xff] }
  0x8f   : > { %4207 = vmatprep.subr.bf16.mxu1 %v4206_v14  ;;  %v5507_v56 = vld [vmem:[%s4929_s24 + $0x1a] sm:$0xff] }
  0x90   : > { %3529 = vmatmul.mubr.f32.gmra.mrb[12].mxu1 %v5162_v53 }
  0x91   : > { %3873 = vmatmul.mubr.f32.gmra.mrb[28].mxu0 %v5481_v1  ;;  %3531 = vmatprep.mubr.f32.mxu1 %v5175_v57  ;;  %v2930_v1 = vld [vmem:[%s6070_s1 + $0x298] sm:$0xff] }
  0x92   : > { %3875 = vmatprep.mubr.f32.mxu0 %v996_v39  ;;  %4209 = vmatpush3.bf16.msra.mxu1 %v4206_v14  ;;  %v1821_v14 = vld [vmem:[%s4929_s24 + $0xa] sm:$0xff]  ;;  %v4346_v44 = vpack.c.bf16 %v2930_v1, %v2929_v54  ;;  %v2931_v39 = vld [vmem:[%s6070_s1 + $0x2a0] sm:$0xff]  ;;  %v5524_v1 = vld [vmem:[%s4929_s24 + $0x32] sm:$0xff] }
  0x93   : > { %4211 = vmatprep.subr.bf16.mxu1 %v4210_v48  ;;  %v5521_v54 = vld [vmem:[%s4929_s24 + $0x22] sm:$0xff] }
  0x94   : > { %3532 = vmatmul.mubr.f32.gmra.mrb[14].mxu1 %v5190_v2 }
  0x95   : > { %3876 = vmatmul.mubr.f32.gmra.mrb[30].mxu0 %v997_v38  ;;  %3534 = vmatprep.mubr.f32.mxu1 %v5203_v11  ;;  %v2932_v38 = vld [vmem:[%s6070_s1 + $0x2a8] sm:$0xff] }
  0x96   : > { %3910 = vmatprep.mubr.f32.mxu0 %v1820_v45  ;;  %4213 = vmatpush3.bf16.msra.mxu1 %v4210_v48  ;;  %v4350_v48 = vpack.c.bf16 %v2932_v38, %v2931_v39  ;;  %v2933_v45 = vld [vmem:[%s6070_s1 + $0x2b0] sm:$0xff] }
  0x97   : > { %4215 = vmatprep.subr.bf16.mxu1 %v5495_v15  ;;  %v5540_v39 = vld [vmem:[%s4929_s24 + $0x4a] sm:$0xff] }
  0x98   : > { %3535 = vmatmul.mubr.f32.gmra.mrb[16].mxu1 %v5218_v24 }
  0x99   : > { %3911 = vmatmul.mubr.f32.vlgmr.msra.gmra.mrb[0].mxu0 %v1821_v14  ;;  %3537 = vmatprep.mubr.f32.mxu1 %v5231_v30  ;;  %v2934_v14 = vld [vmem:[%s6070_s1 + $0x2b8] sm:$0xff] }
  0x9a   : > { %4345 = vmatpush3.bf16.msra.mxu0 %v5371_v60  ;;  %3913 = vmatprep.mubr.f32.mxu0 %v5507_v56  ;;  %v5537_v60 = vld [vmem:[%s4929_s24 + $0x3a] sm:$0xff]  ;;  %v4354_v38 = vpack.c.bf16 %v2934_v14, %v2933_v45  ;;  %v5556_v45 = vld [vmem:[%s4929_s24 + $0x62] sm:$0xff]  ;;  %v4358_v14 = vpack.c.bf16 %v2936_v61, %v2935_v20  ;;  %v4362_v20 = vpack.c.bf16 %v2938_v26, %v2937_v58  ;;  %v5588_v26 = vld [vmem:[%s4929_s24 + $0x92] sm:$0xff] }
  0x9b   : > { %4347 = vmatprep.subr.bf16.mxu0 %v4346_v44  ;;  %v5572_v61 = vld [vmem:[%s4929_s24 + $0x7a] sm:$0xff]  ;;  %v4366_v58 = vpack.c.bf16 %v2940_v19, %v2939_v25  ;;  %v5604_v19 = vld [vmem:[%s4929_s24 + $0xaa] sm:$0xff]  ;;  %v4370_v25 = vpack.c.bf16 %v2942_v3, %v2941_v33  ;;  %v5620_v3 = vld [vmem:[%s4929_s24 + $0xc2] sm:$0xff]  ;;  %v5622_v33 = vpack.c.bf16 %v2944_v52, %v2943_v8 }
  0x9c   : > { %3538 = vmatmul.mubr.f32.gmra.mrb[18].mxu1 %v5245_v40  ;;  %v5635_v52 = vld [vmem:[%s4929_s24 + $0xca] sm:$0xff]  ;;  %v5638_v8 = vld [vmem:[%s4929_s24 + $0xda] sm:$0xff] }
  0x9d   : > { %3914 = vmatmul.mubr.f32.gmra.mrb[2].mxu0 %v5521_v54  ;;  %3540 = vmatprep.mubr.f32.mxu1 %v5249_v42 }
  0x9e   : > { %3916 = vmatprep.mubr.f32.mxu0 %v5524_v1  ;;  %4349 = vmatpush3.bf16.msra.mxu0 %v4346_v44  ;;  %v5553_v44 = vld [vmem:[%s4929_s24 + $0x52] sm:$0xff] }
  0x9f   : > { %4351 = vmatprep.subr.bf16.mxu0 %v4350_v48 }
  0xa0   : > { %3541 = vmatmul.mubr.f32.gmra.mrb[20].mxu1 %v5262_v0 }
  0xa1   : > { %3917 = vmatmul.mubr.f32.gmra.mrb[4].mxu0 %v5537_v60  ;;  %3543 = vmatprep.mubr.f32.mxu1 %v5266_v51 }
  0xa2   : > { %3919 = vmatprep.mubr.f32.mxu0 %v5540_v39  ;;  %4353 = vmatpush3.bf16.msra.mxu0 %v4350_v48  ;;  %v5569_v48 = vld [vmem:[%s4929_s24 + $0x6a] sm:$0xff] }
  0xa3   : > { %4355 = vmatprep.subr.bf16.mxu0 %v4354_v38 }
  0xa4   : > { %3544 = vmatmul.mubr.f32.gmra.mrb[22].mxu1 %v5278_v10 }
  0xa5   : > { %3920 = vmatmul.mubr.f32.gmra.mrb[6].mxu0 %v5553_v44  ;;  %3546 = vmatprep.mubr.f32.mxu1 %v5282_v55 }
  0xa6   : > { %3922 = vmatprep.mubr.f32.mxu0 %v5556_v45  ;;  %4357 = vmatpush3.bf16.msra.mxu0 %v4354_v38  ;;  %v5585_v38 = vld [vmem:[%s4929_s24 + $0x82] sm:$0xff] }
  0xa7   : > { %4359 = vmatprep.subr.bf16.mxu0 %v4358_v14 }
  0xa8   : > { %3547 = vmatmul.mubr.f32.gmra.mrb[24].mxu1 %v5294_v22 }
  0xa9   : > { %3923 = vmatmul.mubr.f32.gmra.mrb[8].mxu0 %v5569_v48  ;;  %3549 = vmatprep.mubr.f32.mxu1 %v5298_v63 }
  0xaa   : > { %3925 = vmatprep.mubr.f32.mxu0 %v5572_v61  ;;  %4361 = vmatpush3.bf16.msra.mxu0 %v4358_v14  ;;  %v5601_v14 = vld [vmem:[%s4929_s24 + $0x9a] sm:$0xff] }
  0xab   : > { %4363 = vmatprep.subr.bf16.mxu0 %v4362_v20 }
  0xac   : > { %3550 = vmatmul.mubr.f32.gmra.mrb[26].mxu1 %v5310_v35 }
  0xad   : > { %3926 = vmatmul.mubr.f32.gmra.mrb[10].mxu0 %v5585_v38  ;;  %3552 = vmatprep.mubr.f32.mxu1 %v5314_v5 }
  0xae   : > { %3928 = vmatprep.mubr.f32.mxu0 %v5588_v26  ;;  %4365 = vmatpush3.bf16.msra.mxu0 %v4362_v20  ;;  %v5617_v20 = vld [vmem:[%s4929_s24 + $0xb2] sm:$0xff] }
  0xaf   : > { %4367 = vmatprep.subr.bf16.mxu0 %v4366_v58 }
  0xb0   : > { %3553 = vmatmul.mubr.f32.gmra.mrb[28].mxu1 %v5326_v47 }
  0xb1   : > { %3929 = vmatmul.mubr.f32.gmra.mrb[12].mxu0 %v5601_v14  ;;  %3555 = vmatprep.mubr.f32.mxu1 %v5330_v18 }
  0xb2   : > { %3931 = vmatprep.mubr.f32.mxu0 %v5604_v19  ;;  %4369 = vmatpush3.bf16.msra.mxu0 %v4366_v58  ;;  %v4218_v58 = vpack.c.bf16 %v2866_v28, %v2865_v36  ;;  %v5653_v28 = vld [vmem:[%s4929_s24 + $0xe2] sm:$0xff] }
  0xb3   : > { %4371 = vmatprep.subr.bf16.mxu0 %v4370_v25 }
  0xb4   : > { %3556 = vmatmul.mubr.f32.gmra.mrb[30].mxu1 %v5342_v27 }
  0xb5   : > { %3932 = vmatmul.mubr.f32.gmra.mrb[14].mxu0 %v5617_v20  ;;  %3590 = vmatprep.mubr.f32.mxu1 %v5036_v62  ;;  %v2868_v62 = vld [vmem:[%s6070_s1 + $0xa8] sm:$0xff] }
  0xb6   : > { %3934 = vmatprep.mubr.f32.mxu0 %v5620_v3  ;;  %4373 = vmatpush3.bf16.msra.mxu0 %v4370_v25  ;;  %v4222_v36 = vpack.c.bf16 %v2868_v62, %v2867_v13  ;;  %v2869_v25 = vld [vmem:[%s6070_s1 + $0xb0] sm:$0xff]  ;;  %v2871_v62 = vld [vmem:[%s6070_s1 + $0xc0] sm:$0xff] }
  0xb7   : > { %4375 = vmatprep.subr.bf16.mxu0 %v5622_v33 }
  0xb8   : > { %3591 = vmatmul.mubr.f32.vlgmr.msra.gmra.mrb[0].mxu1 %v5049_v4  ;;  %v5656_v4 = vld [vmem:[%s4929_s24 + $0xf2] sm:$0xff] }
  0xb9   : > { %3935 = vmatmul.mubr.f32.gmra.mrb[16].mxu0 %v5635_v52  ;;  %4217 = vmatpush3.bf16.msra.mxu1 %v5495_v15  ;;  %v2870_v15 = vld [vmem:[%s6070_s1 + $0xb8] sm:$0xff] }
  0xba   : > { %3593 = vmatprep.mubr.f32.mxu1 %v5062_v9  ;;  %3937 = vmatprep.mubr.f32.mxu0 %v5638_v8  ;;  %v5669_v9 = vld [vmem:[%s4929_s24 + $0xfa] sm:$0xff]  ;;  %v4226_v13 = vpack.c.bf16 %v2870_v15, %v2869_v25  ;;  %v2873_v15 = vld [vmem:[%s6070_s1 + $0xd0] sm:$0xff] }
  0xbb   : > { %4219 = vmatprep.subr.bf16.mxu1 %v4218_v58 }
  0xbc   : > { %3594 = vmatmul.mubr.f32.gmra.mrb[2].mxu1 %v5078_v16  ;;  %v5672_v16 = vld [vmem:[%s4929_s24 + $0x10a] sm:$0xff] }
  0xbd   : > { %3938 = vmatmul.mubr.f32.gmra.mrb[18].mxu0 %v5653_v28  ;;  %3596 = vmatprep.mubr.f32.mxu1 %v5091_v21  ;;  %v2872_v21 = vld [vmem:[%s6070_s1 + $0xc8] sm:$0xff] }
  0xbe   : > { %3940 = vmatprep.mubr.f32.mxu0 %v5656_v4  ;;  %4221 = vmatpush3.bf16.msra.mxu1 %v4218_v58  ;;  %v5685_v58 = vld [vmem:[%s4929_s24 + $0x112] sm:$0xff]  ;;  %v4230_v25 = vpack.c.bf16 %v2872_v21, %v2871_v62  ;;  %v2875_v21 = vld [vmem:[%s6070_s1 + $0xe0] sm:$0xff] }
  0xbf   : > { %4223 = vmatprep.subr.bf16.mxu1 %v4222_v36 }
  0xc0   : > { %3597 = vmatmul.mubr.f32.gmra.mrb[4].mxu1 %v5106_v29  ;;  %v5688_v29 = vld [vmem:[%s4929_s24 + $0x122] sm:$0xff] }
  0xc1   : > { %3941 = vmatmul.mubr.f32.gmra.mrb[20].mxu0 %v5669_v9  ;;  %3599 = vmatprep.mubr.f32.mxu1 %v5119_v34  ;;  %v2874_v34 = vld [vmem:[%s6070_s1 + $0xd8] sm:$0xff] }
  0xc2   : > { %3943 = vmatprep.mubr.f32.mxu0 %v5672_v16  ;;  %4225 = vmatpush3.bf16.msra.mxu1 %v4222_v36  ;;  %v5701_v36 = vld [vmem:[%s4929_s24 + $0x12a] sm:$0xff]  ;;  %v4234_v62 = vpack.c.bf16 %v2874_v34, %v2873_v15 }
  0xc3   : > { %4227 = vmatprep.subr.bf16.mxu1 %v4226_v13  ;;  %v2877_v34 = vld [vmem:[%s6070_s1 + $0xf0] sm:$0xff] }
  0xc4   : > { %3600 = vmatmul.mubr.f32.gmra.mrb[6].mxu1 %v5134_v41  ;;  %v5704_v41 = vld [vmem:[%s4929_s24 + $0x13a] sm:$0xff] }
  0xc5   : > { %3944 = vmatmul.mubr.f32.gmra.mrb[22].mxu0 %v5685_v58  ;;  %3602 = vmatprep.mubr.f32.mxu1 %v5147_v46  ;;  %v2876_v46 = vld [vmem:[%s6070_s1 + $0xe8] sm:$0xff] }
  0xc6   : > { %3946 = vmatprep.mubr.f32.mxu0 %v5688_v29  ;;  %4229 = vmatpush3.bf16.msra.mxu1 %v4226_v13  ;;  %v5717_v13 = vld [vmem:[%s4929_s24 + $0x142] sm:$0xff]  ;;  %v4238_v15 = vpack.c.bf16 %v2876_v46, %v2875_v21  ;;  %v5736_v21 = vld [vmem:[%s4929_s24 + $0x16a] sm:$0xff]  ;;  %v5743_v46 = vld [vmem:[%s4929_s24 + $0x172] sm:$0xff] }
  0xc7   : > { %4231 = vmatprep.subr.bf16.mxu1 %v4230_v25 }
  0xc8   : > { %3603 = vmatmul.mubr.f32.gmra.mrb[8].mxu1 %v5162_v53  ;;  %v5720_v53 = vld [vmem:[%s4929_s24 + $0x152] sm:$0xff] }
  0xc9   : > { %3947 = vmatmul.mubr.f32.gmra.mrb[24].mxu0 %v5701_v36  ;;  %3605 = vmatprep.mubr.f32.mxu1 %v5175_v57  ;;  %v2878_v57 = vld [vmem:[%s6070_s1 + $0xf8] sm:$0xff] }
  0xca   : > { %3949 = vmatprep.mubr.f32.mxu0 %v5704_v41  ;;  %4233 = vmatpush3.bf16.msra.mxu1 %v4230_v25  ;;  %v5733_v25 = vld [vmem:[%s4929_s24 + $0x15a] sm:$0xff] }
  0xcb   : > { %4235 = vmatprep.subr.bf16.mxu1 %v4234_v62 }
  0xcc   : > { %3606 = vmatmul.mubr.f32.gmra.mrb[10].mxu1 %v5190_v2  ;;  %v4242_v2 = vpack.c.bf16 %v2878_v57, %v2877_v34  ;;  %v2958_v34 = vld [vmem:[%s6070_s1 + $0x478] sm:$0xff] }
  0xcd   : > { %3950 = vmatmul.mubr.f32.gmra.mrb[26].mxu0 %v5717_v13  ;;  %3608 = vmatprep.mubr.f32.mxu1 %v5203_v11  ;;  %v2945_v11 = vld [vmem:[%s6070_s1 + $0x410] sm:$0xff] }
  0xce   : > { %3952 = vmatprep.mubr.f32.mxu0 %v5720_v53  ;;  %4237 = vmatpush3.bf16.msra.mxu1 %v4234_v62  ;;  %v2948_v62 = vld [vmem:[%s6070_s1 + $0x428] sm:$0xff] }
  0xcf   : > { %4239 = vmatprep.subr.bf16.mxu1 %v4238_v15 }
  0xd0   : > { %3609 = vmatmul.mubr.f32.gmra.mrb[12].mxu1 %v5218_v24  ;;  %v2946_v24 = vld [vmem:[%s6070_s1 + $0x418] sm:$0xff] }
  0xd1   : > { %3953 = vmatmul.mubr.f32.gmra.mrb[28].mxu0 %v5733_v25  ;;  %3611 = vmatprep.mubr.f32.mxu1 %v5231_v30  ;;  %v4378_v30 = vpack.c.bf16 %v2946_v24, %v2945_v11  ;;  %v4721_v11 = vld [vmem:[%s4929_s24 + $0x21] sm:$0xff]  ;;  %v4722_v24 = vld [vmem:[%s4929_s24 + $0x31] sm:$0xff] }
  0xd2   : > { %3955 = vmatprep.mubr.f32.mxu0 %v5736_v21  ;;  %4241 = vmatpush3.bf16.msra.mxu1 %v4238_v15  ;;  %v2956_v15 = vld [vmem:[%s6070_s1 + $0x468] sm:$0xff] }
  0xd3   : > { %4243 = vmatprep.subr.bf16.mxu1 %v4242_v2 }
  0xd4   : > { %3612 = vmatmul.mubr.f32.gmra.mrb[14].mxu1 %v5245_v40  ;;  %v2947_v40 = vld [vmem:[%s6070_s1 + $0x420] sm:$0xff] }
  0xd5   : > { %3956 = vmatmul.mubr.f32.gmra.mrb[30].mxu0 %v5743_v46  ;;  %3614 = vmatprep.mubr.f32.mxu1 %v5249_v42  ;;  %v4382_v42 = vpack.c.bf16 %v2948_v62, %v2947_v40  ;;  %v4725_v40 = vld [vmem:[%s4929_s24 + $0x51] sm:$0xff]  ;;  %v4727_v62 = vld [vmem:[%s4929_s24 + $0x69] sm:$0xff] }
  0xd6   : > { %3990 = vmatprep.mubr.f32.mxu0 %v5507_v56  ;;  %4245 = vmatpush3.bf16.msra.mxu1 %v4242_v2  ;;  %v2950_v56 = vld [vmem:[%s6070_s1 + $0x438] sm:$0xff]  ;;  %v962_v2 = vld [vmem:[%s4929_s24 + $0x1] sm:$0xff] }
  0xd7   : > { %4406 = vmatprep.subr.bf16.mxu1 %v4886_v7 }
  0xd8   : > { %3615 = vmatmul.mubr.f32.gmra.mrb[16].mxu1 %v5262_v0  ;;  %v2949_v0 = vld [vmem:[%s6070_s1 + $0x430] sm:$0xff] }
  0xd9   : > { %3991 = vmatmul.mubr.f32.vlgmr.msra.gmra.mrb[0].mxu0 %v5521_v54  ;;  %3617 = vmatprep.mubr.f32.mxu1 %v5266_v51  ;;  %v4386_v51 = vpack.c.bf16 %v2950_v56, %v2949_v0  ;;  %v2952_v54 = vld [vmem:[%s6070_s1 + $0x448] sm:$0xff]  ;;  %v4731_v56 = vld [vmem:[%s4929_s24 + $0x99] sm:$0xff] }
  0xda   : > { %4377 = vmatpush3.bf16.msra.mxu0 %v5622_v33  ;;  %3993 = vmatprep.mubr.f32.mxu0 %v5524_v1  ;;  %v2954_v33 = vld [vmem:[%s6070_s1 + $0x458] sm:$0xff]  ;;  %v5861_v0 = vld [vmem:[%s4929_s24 + $0x182] sm:$0xff] }
  0xdb   : > { %4379 = vmatprep.subr.bf16.mxu0 %v4378_v30 }
  0xdc   : > { %3618 = vmatmul.mubr.f32.gmra.mrb[18].mxu1 %v5278_v10  ;;  %v2951_v10 = vld [vmem:[%s6070_s1 + $0x440] sm:$0xff] }
  0xdd   : > { %3994 = vmatmul.mubr.f32.gmra.mrb[2].mxu0 %v5537_v60  ;;  %3620 = vmatprep.mubr.f32.mxu1 %v5282_v55  ;;  %v4390_v55 = vpack.c.bf16 %v2952_v54, %v2951_v10  ;;  %v6130_v10 = vld [vmem:[#allocation10_spill] sm:$0xff] }
  0xde   : > { %3996 = vmatprep.mubr.f32.mxu0 %v5540_v39  ;;  %4381 = vmatpush3.bf16.msra.mxu0 %v4378_v30  ;;  %v4724_v30 = vld [vmem:[%s4929_s24 + $0x49] sm:$0xff] }
  0xdf   : > { %4383 = vmatprep.subr.bf16.mxu0 %v4382_v42 }
  0xe0   : > { %3621 = vmatmul.mubr.f32.gmra.mrb[20].mxu1 %v5294_v22  ;;  %v2953_v22 = vld [vmem:[%s6070_s1 + $0x450] sm:$0xff] }
  0xe1   : > { %3997 = vmatmul.mubr.f32.gmra.mrb[4].mxu0 %v5553_v44  ;;  %3623 = vmatprep.mubr.f32.mxu1 %v5298_v63  ;;  %v4394_v63 = vpack.c.bf16 %v2954_v33, %v2953_v22  ;;  %v5948_v22 = vld [vmem:[%s6071_s2] ss:$0 sm:$0xff] }
  0xe2   : > { %3999 = vmatprep.mubr.f32.mxu0 %v5556_v45  ;;  %4385 = vmatpush3.bf16.msra.mxu0 %v4382_v42  ;;  %v4729_v42 = vld [vmem:[%s4929_s24 + $0x81] sm:$0xff] }
  0xe3   : > { %4387 = vmatprep.subr.bf16.mxu0 %v4386_v51 }
  0xe4   : > { %3624 = vmatmul.mubr.f32.gmra.mrb[22].mxu1 %v5310_v35  ;;  %v2955_v35 = vld [vmem:[%s6070_s1 + $0x460] sm:$0xff] }
  0xe5   : > { %4000 = vmatmul.mubr.f32.gmra.mrb[6].mxu0 %v5569_v48  ;;  %3626 = vmatprep.mubr.f32.mxu1 %v5314_v5  ;;  %v4398_v5 = vpack.c.bf16 %v2956_v15, %v2955_v35 }
  0xe6   : > { %4002 = vmatprep.mubr.f32.mxu0 %v5572_v61  ;;  %4389 = vmatpush3.bf16.msra.mxu0 %v4386_v51  ;;  %v6126_v51 = vld [vmem:[#allocation6_spill] sm:$0xff] }
  0xe7   : > { %4391 = vmatprep.subr.bf16.mxu0 %v4390_v55 }
  0xe8   : > { %3627 = vmatmul.mubr.f32.gmra.mrb[24].mxu1 %v5326_v47  ;;  %v2957_v47 = vld [vmem:[%s6070_s1 + $0x470] sm:$0xff] }
  0xe9   : > { %4003 = vmatmul.mubr.f32.gmra.mrb[8].mxu0 %v5585_v38  ;;  %3629 = vmatprep.mubr.f32.mxu1 %v5330_v18  ;;  %v203_v18 = vld [vmem:[%s4929_s24 + $0x198] sm:$0xff]  ;;  %v4402_v57 = vpack.c.bf16 %v2958_v34, %v2957_v47 }
  0xea   : > { %4005 = vmatprep.mubr.f32.mxu0 %v5588_v26  ;;  %4393 = vmatpush3.bf16.msra.mxu0 %v4390_v55 }
  0xeb   : > { %4395 = vmatprep.subr.bf16.mxu0 %v4394_v63 }
  0xec   : > { %3630 = vmatmul.mubr.f32.gmra.mrb[26].mxu1 %v5342_v27  ;;  %v204_v27 = vld [vmem:[%s4929_s24 + $0x1a0] sm:$0xff] }
  0xed   : > { %4006 = vmatmul.mubr.f32.gmra.mrb[10].mxu0 %v5601_v14  ;;  %3632 = vmatprep.mubr.f32.mxu1 %v5346_v32  ;;  %v963_v32 = vld [vmem:[%s4929_s24 + $0x9] sm:$0xff] }
  0xee   : > { %4008 = vmatprep.mubr.f32.mxu0 %v5604_v19  ;;  %4397 = vmatpush3.bf16.msra.mxu0 %v4394_v63 }
  0xef   : > { %4399 = vmatprep.subr.bf16.mxu0 %v4398_v5 }
  0xf0   : > { %3633 = vmatmul.mubr.f32.gmra.mrb[28].mxu1 %v5361_v50  ;;  %v4720_v50 = vld [vmem:[%s4929_s24 + $0x19] sm:$0xff] }
  0xf1   : > { %4009 = vmatmul.mubr.f32.gmra.mrb[12].mxu0 %v5617_v20  ;;  %3635 = vmatprep.mubr.f32.mxu1 %v203_v18 }
  0xf2   : > { %4011 = vmatprep.mubr.f32.mxu0 %v5620_v3  ;;  %4401 = vmatpush3.bf16.msra.mxu0 %v4398_v5 }
  0xf3   : > { %4403 = vmatprep.subr.bf16.mxu0 %v4402_v57 }
  0xf4   : > { %3636 = vmatmul.mubr.f32.gmra.mrb[30].mxu1 %v204_v27 }
  0xf5   : > { %4012 = vmatmul.mubr.f32.gmra.mrb[14].mxu0 %v5635_v52  ;;  %3670 = vmatprep.mubr.f32.mxu1 %v962_v2 }
  0xf6   : > { %4014 = vmatprep.mubr.f32.mxu0 %v5638_v8  ;;  %4405 = vmatpush3.bf16.msra.mxu0 %v4402_v57 }
  0xf8   : > { %3671 = vmatmul.mubr.f32.vlgmr.msra.gmra.mrb[0].mxu1 %v963_v32 }
  0xf9   : > { %4015 = vmatmul.mubr.f32.gmra.mrb[16].mxu0 %v5653_v28  ;;  %4414 = vmatpush3.bf16.msra.mxu1 %v4886_v7  ;;  %v4723_v7 = vld [vmem:[%s4929_s24 + $0x39] sm:$0xff] }
  0xfa   : > { %3673 = vmatprep.mubr.f32.mxu1 %v4720_v50  ;;  %4017 = vmatprep.mubr.f32.mxu0 %v5656_v4 }
  0xfb   : > { %4407 = vmatprep.subr.bf16.mxu1 %v4898_v12 }
  0xfc   : > { %3674 = vmatmul.mubr.f32.gmra.mrb[2].mxu1 %v4721_v11 }
  0xfd   : > { %4018 = vmatmul.mubr.f32.gmra.mrb[18].mxu0 %v5669_v9  ;;  %3676 = vmatprep.mubr.f32.mxu1 %v4722_v24 }
  0xfe   : > { %4020 = vmatprep.mubr.f32.mxu0 %v5672_v16  ;;  %4415 = vmatpush3.bf16.msra.mxu1 %v4898_v12  ;;  %v4726_v12 = vld [vmem:[%s4929_s24 + $0x61] sm:$0xff] }
  0xff   : > { %4408 = vmatprep.subr.bf16.mxu1 %v4912_v17 }
 0x100   : > { %3677 = vmatmul.mubr.f32.gmra.mrb[4].mxu1 %v4723_v7 }
 0x101   : > { %4021 = vmatmul.mubr.f32.gmra.mrb[20].mxu0 %v5685_v58  ;;  %3679 = vmatprep.mubr.f32.mxu1 %v4724_v30 }
 0x102   : > { %4023 = vmatprep.mubr.f32.mxu0 %v5688_v29  ;;  %4416 = vmatpush3.bf16.msra.mxu1 %v4912_v17  ;;  %v4728_v17 = vld [vmem:[%s4929_s24 + $0x79] sm:$0xff] }
 0x103   : > { %4409 = vmatprep.subr.bf16.mxu1 %v4933_v23 }
 0x104   : > { %3680 = vmatmul.mubr.f32.gmra.mrb[6].mxu1 %v4725_v40 }
 0x105   : > { %4024 = vmatmul.mubr.f32.gmra.mrb[22].mxu0 %v5701_v36  ;;  %3682 = vmatprep.mubr.f32.mxu1 %v4726_v12 }
 0x106   : > { %4026 = vmatprep.mubr.f32.mxu0 %v5704_v41  ;;  %4417 = vmatpush3.bf16.msra.mxu1 %v4933_v23  ;;  %v4730_v23 = vld [vmem:[%s4929_s24 + $0x91] sm:$0xff] }
 0x107   : > { %4410 = vmatprep.subr.bf16.mxu1 %v4954_v31 }
 0x108   : > { %3683 = vmatmul.mubr.f32.gmra.mrb[8].mxu1 %v4727_v62 }
 0x109   : > { %4027 = vmatmul.mubr.f32.gmra.mrb[24].mxu0 %v5717_v13  ;;  %3685 = vmatprep.mubr.f32.mxu1 %v4728_v17 }
 0x10a   : > { %4029 = vmatprep.mubr.f32.mxu0 %v5720_v53  ;;  %4418 = vmatpush3.bf16.msra.mxu1 %v4954_v31  ;;  %v5869_v31 = vld [vmem:[%s4929_s24 + $0x18a] sm:$0xff] }
 0x10b   : > { %4411 = vmatprep.subr.bf16.mxu1 %v4970_v37 }
 0x10c   : > { %3686 = vmatmul.mubr.f32.gmra.mrb[10].mxu1 %v4729_v42 }
 0x10d   : > { %4030 = vmatmul.mubr.f32.gmra.mrb[26].mxu0 %v5733_v25  ;;  %3688 = vmatprep.mubr.f32.mxu1 %v4730_v23 }
 0x10e   : > { %4032 = vmatprep.mubr.f32.mxu0 %v5736_v21  ;;  %4419 = vmatpush3.bf16.msra.mxu1 %v4970_v37  ;;  %v6125_v37 = vld [vmem:[#allocation5_spill] sm:$0xff] }
 0x10f   : > { %4412 = vmatprep.subr.bf16.mxu1 %v4986_v43 }
 0x110   : > { %3689 = vmatmul.mubr.f32.gmra.mrb[12].mxu1 %v4731_v56 }
 0x111   : > { %4033 = vmatmul.mubr.f32.gmra.mrb[28].mxu0 %v5743_v46  ;;  %3691 = vmatprep.mubr.f32.mxu1 %v5178_v59  ;;  %v6127_v59 = vld [vmem:[#allocation7_spill] sm:$0xff] }
 0x112   : > { %4035 = vmatprep.mubr.f32.mxu0 %v5861_v0  ;;  %4420 = vmatpush3.bf16.msra.mxu1 %v4986_v43  ;;  %v6128_v43 = vld [vmem:[#allocation8_spill] sm:$0xff] }
 0x113   : > { %4413 = vmatprep.subr.bf16.mxu1 %v5002_v49 }
 0x114   : > { %3692 = vmatmul.mubr.f32.gmra.mrb[14].mxu1 %v5200_v6  ;;  %v6129_v6 = vld [vmem:[#allocation9_spill] sm:$0xff] }
 0x115   : > { %4036 = vmatmul.mubr.f32.gmra.mrb[30].mxu0 %v5869_v31  ;;  %3694 = vmatprep.mubr.f32.mxu1 %v6125_v37 }
 0x116   : > { %4070 = vmatprep.mubr.f32.mxu0 %v5524_v1  ;;  %4421 = vmatpush3.bf16.msra.mxu1 %v5002_v49  ;;  %v6131_v49 = vld [vmem:[#allocation11_spill] sm:$0xff]  ;;  %v6132_v1 = vld [vmem:[#allocation12_spill] sm:$0xff] }
 0x118   : > { %3695 = vmatmul.mubr.f32.gmra.mrb[16].mxu1 %v6126_v51 }
 0x119   : > { %4071 = vmatmul.mubr.f32.vlgmr.msra.gmra.mrb[0].mxu0 %v5537_v60  ;;  %3697 = vmatprep.mubr.f32.mxu1 %v6127_v59  ;;  %v6133_v60 = vld [vmem:[#allocation13_spill] sm:$0xff] }
 0x11a   : > { %4073 = vmatprep.mubr.f32.mxu0 %v5540_v39  ;;  %v6134_v39 = vld [vmem:[#allocation14_spill] sm:$0xff] }
 0x11c   : > { %3698 = vmatmul.mubr.f32.gmra.mrb[18].mxu1 %v6128_v43 }
 0x11d   : > { %4074 = vmatmul.mubr.f32.gmra.mrb[2].mxu0 %v5553_v44  ;;  %3700 = vmatprep.mubr.f32.mxu1 %v6129_v6  ;;  %v6135_v44 = vld [vmem:[#allocation15_spill] sm:$0xff] }
 0x11e   : > { %4076 = vmatprep.mubr.f32.mxu0 %v5556_v45  ;;  %v6136_v45 = vld [vmem:[#allocation16_spill] sm:$0xff] }
 0x120   : > { %3701 = vmatmul.mubr.f32.gmra.mrb[20].mxu1 %v6130_v10 }
 0x121   : > { %4077 = vmatmul.mubr.f32.gmra.mrb[4].mxu0 %v5569_v48  ;;  %3703 = vmatprep.mubr.f32.mxu1 %v6131_v49  ;;  %v6137_v48 = vld [vmem:[#allocation17_spill] sm:$0xff] }
 0x122   : > { %4079 = vmatprep.mubr.f32.mxu0 %v5572_v61  ;;  %v6138_v61 = vld [vmem:[#allocation18_spill] sm:$0xff] }
 0x124   : > { %3704 = vmatmul.mubr.f32.gmra.mrb[22].mxu1 %v6132_v1 }
 0x125   : > { %4080 = vmatmul.mubr.f32.gmra.mrb[6].mxu0 %v5585_v38  ;;  %3706 = vmatprep.mubr.f32.mxu1 %v6133_v60  ;;  %v6139_v38 = vld [vmem:[#allocation19_spill] sm:$0xff] }
 0x126   : > { %4082 = vmatprep.mubr.f32.mxu0 %v5588_v26  ;;  %v6140_v26 = vld [vmem:[#allocation20_spill] sm:$0xff] }
 0x128   : > { %3707 = vmatmul.mubr.f32.gmra.mrb[24].mxu1 %v6134_v39 }
 0x129   : > { %4083 = vmatmul.mubr.f32.gmra.mrb[8].mxu0 %v5601_v14  ;;  %3709 = vmatprep.mubr.f32.mxu1 %v6135_v44  ;;  %v1854_v14 = vld [vmem:[%s4929_s24 + $0x19a] sm:$0xff] }
 0x12a   : > { %4085 = vmatprep.mubr.f32.mxu0 %v5604_v19  ;;  %v6141_v19 = vld [vmem:[#allocation21_spill] sm:$0xff] }
 0x12c   : > { %3710 = vmatmul.mubr.f32.gmra.mrb[26].mxu1 %v6136_v45 }
 0x12d   : > { %4086 = vmatmul.mubr.f32.gmra.mrb[10].mxu0 %v5617_v20  ;;  %3712 = vmatprep.mubr.f32.mxu1 %v6137_v48  ;;  %v1855_v20 = vld [vmem:[%s4929_s24 + $0x1a2] sm:$0xff]  ;;  %s161_s24 = sand.u32 1, %s4786_s13  }
 0x12e   : > { %4088 = vmatprep.mubr.f32.mxu0 %v5620_v3  ;;  %v6142_v3 = vld [vmem:[#allocation22_spill] sm:$0xff]  ;;  %s2829_s26 = sshll.u32 %s161_s24, 8  ;;  %s6028_s16 = scalar_lea.sflag [#allocation3], %s161_s24 }
 0x12f   : > { %s5952_s29 = scalar_lea.vmem [#allocation2], %s2829_s26 }
 0x130   : > { %3713 = vmatmul.mubr.f32.gmra.mrb[28].mxu1 %v6138_v61  ;;  %s2763_s4 = sshll.u32 %s5952_s29, 4  ;;  %s6021_s4 = int_to_ptr.vmem [resolvable:$true] %s2763_s4 }
 0x131   : > { %4089 = vmatmul.mubr.f32.gmra.mrb[12].mxu0 %v5635_v52  ;;  %3715 = vmatprep.mubr.f32.mxu1 %v6139_v38  ;;  %s4732_s8 = scalar_lea.vmem %s6021_s4, 4096  ;;  %p4739_p0 = scmp.lt.s32.totalorder %s6021_s4, %s4737_s10 }
 0x132   : > { %4091 = vmatprep.mubr.f32.mxu0 %v5638_v8  ;;  %p4733_p11 = scmp.ne.s32.totalorder %s6021_s4, %s4732_s8  ;;  %p4740_p1 = scmp.lt.s32.totalorder %s4738_s11, %s4732_s8 }
 0x134   : > { %3716 = vmatmul.mubr.f32.gmra.mrb[30].mxu1 %v6140_v26  ;;  %p4734_p12 = pnand %p4733_p11, %p4857_p5  ;;  %p4741_p2 = por %p4740_p1, %p4739_p0 }
 0x135   : > { %4092 = vmatmul.mubr.f32.gmra.mrb[14].mxu0 %v5653_v28  ;;  %3774 = vmatprep.mubr.f32.mxu1 %v6127_v59 }
 0x136   : > { %4094 = vmatprep.mubr.f32.mxu0 %v5656_v4  ;;  %p4735_p13 = pneg %p4734_p12 }
 0x138   : > { %3775 = vmatmul.mubr.f32.vlgmr.msra.gmra.mrb[16].mxu1 %v6128_v43  ;;  %p4742_p3 = pnand %p4741_p2, %p4735_p13 }
 0x139   : > { %4095 = vmatmul.mubr.f32.gmra.mrb[16].mxu0 %v5669_v9  ;;  %3777 = vmatprep.mubr.f32.mxu1 %v6129_v6 }
 0x13a   : > { %4097 = vmatprep.mubr.f32.mxu0 %v5672_v16 }
 0x13c   : > { %3778 = vmatmul.mubr.f32.gmra.mrb[18].mxu1 %v6130_v10 }
 0x13d   : > { %4098 = vmatmul.mubr.f32.gmra.mrb[18].mxu0 %v5685_v58  ;;  %3780 = vmatprep.mubr.f32.mxu1 %v6131_v49 }
 0x13e   : > { %4100 = vmatprep.mubr.f32.mxu0 %v5688_v29 }
 0x140   : > { %3781 = vmatmul.mubr.f32.gmra.mrb[20].mxu1 %v6132_v1 }
 0x141   : > { %4101 = vmatmul.mubr.f32.gmra.mrb[20].mxu0 %v5701_v36  ;;  %3783 = vmatprep.mubr.f32.mxu1 %v6133_v60 }
 0x142   : > { %4103 = vmatprep.mubr.f32.mxu0 %v5704_v41 }
 0x144   : > { %3784 = vmatmul.mubr.f32.gmra.mrb[22].mxu1 %v6134_v39 }
 0x145   : > { %4104 = vmatmul.mubr.f32.gmra.mrb[22].mxu0 %v5717_v13  ;;  %3786 = vmatprep.mubr.f32.mxu1 %v6135_v44 }
 0x146   : > { %4106 = vmatprep.mubr.f32.mxu0 %v5720_v53 }
 0x148   : > { %3787 = vmatmul.mubr.f32.gmra.mrb[24].mxu1 %v6136_v45 }
 0x149   : > { %4107 = vmatmul.mubr.f32.gmra.mrb[24].mxu0 %v5733_v25  ;;  %3789 = vmatprep.mubr.f32.mxu1 %v6137_v48 }
 0x14a   : > { %4109 = vmatprep.mubr.f32.mxu0 %v5736_v21 }
 0x14c   : > { %3790 = vmatmul.mubr.f32.gmra.mrb[26].mxu1 %v6138_v61 }
 0x14d   : > { %4110 = vmatmul.mubr.f32.gmra.mrb[26].mxu0 %v5743_v46  ;;  %3792 = vmatprep.mubr.f32.mxu1 %v6139_v38 }
 0x14e   : > { %4112 = vmatprep.mubr.f32.mxu0 %v5861_v0 }
 0x150   : > { %3793 = vmatmul.mubr.f32.gmra.mrb[28].mxu1 %v6140_v26 }
 0x151   : > { %4113 = vmatmul.mubr.f32.gmra.mrb[28].mxu0 %v5869_v31  ;;  %3795 = vmatprep.mubr.f32.mxu1 %v6141_v19 }
 0x152   : > { %4115 = vmatprep.mubr.f32.mxu0 %v1854_v14 }
 0x154   : > { %3796 = vmatmul.mubr.f32.gmra.mrb[30].mxu1 %v6142_v3 }
 0x155   : > { %4116 = vmatmul.mubr.f32.gmra.mrb[30].mxu0 %v1855_v20 }
 0x1cb   : > { %v3672_v52 = vpop.f32.mrb[0].mxu1 }
 0x1cc   : > { %v1081_v8 = vpop.f32.mrb[1].mxu1 }
 0x1cf   : > { %v3675_v28 = vpop.f32.mrb[2].mxu1 }
 0x1d0   : > { %v1091_v4 = vpop.f32.mrb[3].mxu1 }
 0x1d3   : > { %v3678_v9 = vpop.f32.mrb[4].mxu1 }
 0x1d4   : > { %v1101_v16 = vpop.f32.mrb[5].mxu1 }
 0x1d7   : > { %v3681_v58 = vpop.f32.mrb[6].mxu1 }
 0x1d8   : > { %v1111_v29 = vpop.f32.mrb[7].mxu1 }
 0x1db   : > { %v3684_v36 = vpop.f32.mrb[8].mxu1 }
 0x1dc   : > { %v1121_v41 = vpop.f32.mrb[9].mxu1 }
 0x1df   : > { %v3687_v13 = vpop.f32.mrb[10].mxu1 }
 0x1e0   : > { %v1131_v53 = vpop.f32.mrb[11].mxu1 }
 0x1e3   : > { %v3690_v25 = vpop.f32.mrb[12].mxu1 }
 0x1e4   : > { %v1141_v21 = vpop.f32.mrb[13].mxu1 }
 0x1e7   : > { %v3693_v46 = vpop.f32.mrb[14].mxu1 }
 0x1e8   : > { %v5940_v54 = vpop.f32.mrb[15].mxu1 }
 0x1ec   : > { %v4072_v55 = vpop.f32.mrb[0].mxu0 }
 0x1ed   : > { %v4422_v33 = vadd.f32 %v4072_v55, %v3672_v52  ;;  %v2487_v63 = vpop.f32.mrb[1].mxu0 }
 0x1ee   : > { %v4423_v35 = vadd.f32 %v2487_v63, %v1081_v8 }
 0x1ef   : > { %v2686_v15 = vadd.f32 %v4422_v33, %v5948_v22 }
 0x1f0   : > { %v2685_v5 = vadd.f32 %v4423_v35, %v5948_v22  ;;  %v4075_v47 = vpop.f32.mrb[2].mxu0 }
 0x1f1   : > { %2718 = vst [vmem:[%s5952_s29 + $0x8] sm:$0xff] %v2686_v15  ;;  %v4424_v34 = vadd.f32 %v4075_v47, %v3675_v28  ;;  %v2497_v18 = vpop.f32.mrb[3].mxu0 }
 0x1f2   : > { %2717 = vst [vmem:[%s5952_s29] sm:$0xff] %v2685_v5  ;;  %v4425_v57 = vadd.f32 %v2497_v18, %v1091_v4 }
 0x1f3   : > { %v2688_v27 = vadd.f32 %v4424_v34, %v5948_v22 }
 0x1f4   : > { %v2687_v2 = vadd.f32 %v4425_v57, %v5948_v22  ;;  %v4078_v32 = vpop.f32.mrb[4].mxu0 }
 0x1f5   : > { %2720 = vst [vmem:[%s5952_s29 + $0x18] sm:$0xff] %v2688_v27  ;;  %v4426_v50 = vadd.f32 %v4078_v32, %v3678_v9  ;;  %v2507_v11 = vpop.f32.mrb[5].mxu0 }
 0x1f6   : > { %2719 = vst [vmem:[%s5952_s29 + $0x10] sm:$0xff] %v2687_v2  ;;  %v4427_v24 = vadd.f32 %v2507_v11, %v1101_v16 }
 0x1f7   : > { %v2690_v7 = vadd.f32 %v4426_v50, %v5948_v22 }
 0x1f8   : > { %v2689_v30 = vadd.f32 %v4427_v24, %v5948_v22  ;;  %v4081_v40 = vpop.f32.mrb[6].mxu0 }
 0x1f9   : > { %2722 = vst [vmem:[%s5952_s29 + $0x28] sm:$0xff] %v2690_v7  ;;  %v4428_v12 = vadd.f32 %v4081_v40, %v3681_v58  ;;  %v2517_v62 = vpop.f32.mrb[7].mxu0 }
 0x1fa   : > { %2721 = vst [vmem:[%s5952_s29 + $0x20] sm:$0xff] %v2689_v30  ;;  %v4429_v17 = vadd.f32 %v2517_v62, %v1111_v29 }
 0x1fb   : > { %v2692_v42 = vadd.f32 %v4428_v12, %v5948_v22 }
 0x1fc   : > { %v2691_v23 = vadd.f32 %v4429_v17, %v5948_v22  ;;  %v4084_v0 = vpop.f32.mrb[8].mxu0 }
 0x1fd   : > { %2724 = vst [vmem:[%s5952_s29 + $0x38] sm:$0xff] %v2692_v42  ;;  %v4430_v56 = vadd.f32 %v4084_v0, %v3684_v36  ;;  %v2527_v31 = vpop.f32.mrb[9].mxu0 }
 0x1fe   : > { %2723 = vst [vmem:[%s5952_s29 + $0x30] sm:$0xff] %v2691_v23  ;;  %v4431_v37 = vadd.f32 %v2527_v31, %v1121_v41 }
 0x1ff   : > { %v2694_v51 = vadd.f32 %v4430_v56, %v5948_v22 }
 0x200   : > { %v2693_v59 = vadd.f32 %v4431_v37, %v5948_v22  ;;  %v4087_v43 = vpop.f32.mrb[10].mxu0 }
 0x201   : > { %2726 = vst [vmem:[%s5952_s29 + $0x48] sm:$0xff] %v2694_v51  ;;  %v4432_v6 = vadd.f32 %v4087_v43, %v3687_v13  ;;  %v2537_v10 = vpop.f32.mrb[11].mxu0 }
 0x202   : > { %2725 = vst [vmem:[%s5952_s29 + $0x40] sm:$0xff] %v2693_v59  ;;  %v4433_v49 = vadd.f32 %v2537_v10, %v1131_v53 }
 0x203   : > { %v2696_v1 = vadd.f32 %v4432_v6, %v5948_v22 }
 0x204   : > { %v2695_v60 = vadd.f32 %v4433_v49, %v5948_v22  ;;  %v4090_v39 = vpop.f32.mrb[12].mxu0 }
 0x205   : > { %2728 = vst [vmem:[%s5952_s29 + $0x58] sm:$0xff] %v2696_v1  ;;  %v4434_v44 = vadd.f32 %v4090_v39, %v3690_v25  ;;  %v2547_v45 = vpop.f32.mrb[13].mxu0 }
 0x206   : > { %2727 = vst [vmem:[%s5952_s29 + $0x50] sm:$0xff] %v2695_v60  ;;  %v4435_v48 = vadd.f32 %v2547_v45, %v1141_v21 }
 0x207   : > { %v2698_v61 = vadd.f32 %v4434_v44, %v5948_v22 }
 0x208   : > { %v2697_v38 = vadd.f32 %v4435_v48, %v5948_v22  ;;  %v4093_v26 = vpop.f32.mrb[14].mxu0 }
 0x209   : > { %2730 = vst [vmem:[%s5952_s29 + $0x68] sm:$0xff] %v2698_v61  ;;  %v4436_v14 = vadd.f32 %v4093_v26, %v3693_v46  ;;  %v2557_v19 = vpop.f32.mrb[15].mxu0 }
 0x20a   : > { %2729 = vst [vmem:[%s5952_s29 + $0x60] sm:$0xff] %v2697_v38  ;;  %v4437_v20 = vadd.f32 %v2557_v19, %v5940_v54 }
 0x20b   : > { %v2700_v3 = vadd.f32 %v4436_v14, %v5948_v22  ;;  %v3776_v52 = vpop.f32.mrb[16].mxu1 }
 0x20c   : > { %v2699_v8 = vadd.f32 %v4437_v20, %v5948_v22  ;;  %v4096_v28 = vpop.f32.mrb[16].mxu0  ;;  %v1435_v4 = vpop.f32.mrb[17].mxu1 }
 0x20d   : > { %2732 = vst [vmem:[%s5952_s29 + $0x78] sm:$0xff] %v2700_v3  ;;  %v4438_v9 = vadd.f32 %v4096_v28, %v3776_v52  ;;  %v2567_v16 = vpop.f32.mrb[17].mxu0 }
 0x20e   : > { %2731 = vst [vmem:[%s5952_s29 + $0x70] sm:$0xff] %v2699_v8  ;;  %v4439_v58 = vadd.f32 %v2567_v16, %v1435_v4 }
 0x20f   : > { %v2702_v29 = vadd.f32 %v4438_v9, %v5948_v22  ;;  %v3779_v36 = vpop.f32.mrb[18].mxu1 }
 0x210   : > { %v2701_v41 = vadd.f32 %v4439_v58, %v5948_v22  ;;  %v4099_v13 = vpop.f32.mrb[18].mxu0  ;;  %v1445_v53 = vpop.f32.mrb[19].mxu1 }
 0x211   : > { %2734 = vst [vmem:[%s5952_s29 + $0x88] sm:$0xff] %v2702_v29  ;;  %v4440_v25 = vadd.f32 %v4099_v13, %v3779_v36  ;;  %v2577_v21 = vpop.f32.mrb[19].mxu0 }
 0x212   : > { %2733 = vst [vmem:[%s5952_s29 + $0x80] sm:$0xff] %v2701_v41  ;;  %v4441_v46 = vadd.f32 %v2577_v21, %v1445_v53 }
 0x213   : > { %v2704_v54 = vadd.f32 %v4440_v25, %v5948_v22  ;;  %v3782_v55 = vpop.f32.mrb[20].mxu1 }
 0x214   : > { %v2703_v33 = vadd.f32 %v4441_v46, %v5948_v22  ;;  %v4102_v63 = vpop.f32.mrb[20].mxu0  ;;  %v1455_v35 = vpop.f32.mrb[21].mxu1 }
 0x215   : > { %2736 = vst [vmem:[%s5952_s29 + $0x98] sm:$0xff] %v2704_v54  ;;  %v4442_v15 = vadd.f32 %v4102_v63, %v3782_v55  ;;  %v2587_v5 = vpop.f32.mrb[21].mxu0 }
 0x216   : > { %2735 = vst [vmem:[%s5952_s29 + $0x90] sm:$0xff] %v2703_v33  ;;  %v4443_v47 = vadd.f32 %v2587_v5, %v1455_v35 }
 0x217   : > { %v2706_v34 = vadd.f32 %v4442_v15, %v5948_v22  ;;  %v3785_v18 = vpop.f32.mrb[22].mxu1 }
 0x218   : > { %v2705_v57 = vadd.f32 %v4443_v47, %v5948_v22  ;;  %v4105_v27 = vpop.f32.mrb[22].mxu0  ;;  %v1465_v2 = vpop.f32.mrb[23].mxu1 }
 0x219   : > { %2738 = vst [vmem:[%s5952_s29 + $0xa8] sm:$0xff] %v2706_v34  ;;  %v4444_v32 = vadd.f32 %v4105_v27, %v3785_v18  ;;  %v2597_v50 = vpop.f32.mrb[23].mxu0 }
 0x21a   : > { %2737 = vst [vmem:[%s5952_s29 + $0xa0] sm:$0xff] %v2705_v57  ;;  %v4445_v11 = vadd.f32 %v2597_v50, %v1465_v2 }
 0x21b   : > { %v2708_v24 = vadd.f32 %v4444_v32, %v5948_v22  ;;  %v3788_v7 = vpop.f32.mrb[24].mxu1 }
 0x21c   : > { %v2707_v30 = vadd.f32 %v4445_v11, %v5948_v22  ;;  %v4108_v40 = vpop.f32.mrb[24].mxu0  ;;  %v1475_v12 = vpop.f32.mrb[25].mxu1 }
 0x21d   : > { %2740 = vst [vmem:[%s5952_s29 + $0xb8] sm:$0xff] %v2708_v24  ;;  %v4446_v62 = vadd.f32 %v4108_v40, %v3788_v7  ;;  %v2607_v17 = vpop.f32.mrb[25].mxu0 }
 0x21e   : > { %2739 = vst [vmem:[%s5952_s29 + $0xb0] sm:$0xff] %v2707_v30  ;;  %v4447_v42 = vadd.f32 %v2607_v17, %v1475_v12 }
 0x21f   : > { %v2710_v23 = vadd.f32 %v4446_v62, %v5948_v22  ;;  %v3791_v0 = vpop.f32.mrb[26].mxu1 }
 0x220   : > { %v2709_v56 = vadd.f32 %v4447_v42, %v5948_v22  ;;  %v4111_v31 = vpop.f32.mrb[26].mxu0  ;;  %v1485_v37 = vpop.f32.mrb[27].mxu1 }
 0x221   : > { %2742 = vst [vmem:[%s5952_s29 + $0xc8] sm:$0xff] %v2710_v23  ;;  %v4448_v51 = vadd.f32 %v4111_v31, %v3791_v0  ;;  %v2617_v59 = vpop.f32.mrb[27].mxu0 }
 0x222   : > { %2741 = vst [vmem:[%s5952_s29 + $0xc0] sm:$0xff] %v2709_v56  ;;  %v4449_v43 = vadd.f32 %v2617_v59, %v1485_v37 }
 0x223   : > { %v2712_v6 = vadd.f32 %v4448_v51, %v5948_v22  ;;  %v3794_v10 = vpop.f32.mrb[28].mxu1 }
 0x224   : > { %v2711_v49 = vadd.f32 %v4449_v43, %v5948_v22  ;;  %v4114_v1 = vpop.f32.mrb[28].mxu0  ;;  %v1495_v60 = vpop.f32.mrb[29].mxu1 }
 0x225   : > { %2744 = vst [vmem:[%s5952_s29 + $0xd8] sm:$0xff] %v2712_v6  ;;  %v4450_v39 = vadd.f32 %v4114_v1, %v3794_v10  ;;  %v2627_v44 = vpop.f32.mrb[29].mxu0 }
 0x226   : > { %2743 = vst [vmem:[%s5952_s29 + $0xd0] sm:$0xff] %v2711_v49  ;;  %v4451_v45 = vadd.f32 %v2627_v44, %v1495_v60 }
 0x227   : > { %v2714_v48 = vadd.f32 %v4450_v39, %v5948_v22  ;;  %v3797_v61 = vpop.f32.mrb[30].mxu1 }
 0x228   : > { %v2713_v38 = vadd.f32 %v4451_v45, %v5948_v22  ;;  %v4117_v26 = vpop.f32.mrb[30].mxu0  ;;  %v1505_v14 = vpop.f32.mrb[31].mxu1 }
 0x229   : > { %2746 = vst [vmem:[%s5952_s29 + $0xe8] sm:$0xff] %v2714_v48  ;;  %v4452_v19 = vadd.f32 %v4117_v26, %v3797_v61  ;;  %v2637_v20 = vpop.f32.mrb[31].mxu0 }
 0x22a   : > { %2745 = vst [vmem:[%s5952_s29 + $0xe0] sm:$0xff] %v2713_v38  ;;  %v4453_v3 = vadd.f32 %v2637_v20, %v1505_v14 }
 0x22b   : > { %v2716_v52 = vadd.f32 %v4452_v19, %v5948_v22 }
 0x22c   : > { %v2715_v8 = vadd.f32 %v4453_v3, %v5948_v22 }
 0x22d   : > { %2748 = vst [vmem:[%s5952_s29 + $0xf8] sm:$0xff] %v2716_v52 }
 0x22e   : > { %2747 = vst [vmem:[%s5952_s29 + $0xf0] sm:$0xff] %v2715_v8 }
 0x22f   : > { %4745 = shalt.err (!%p4742_p3)
}
 0x230   : > { %s4746_s17 = scalar_lea.hbm %s6019_s7, 4096  ;;  %s4750_s25 = scalar_lea.hbm %s6072_s3, 8192 }
 0x231   : > { %p4747_p4 = scmp.ne.s32.totalorder %s6019_s7, %s4746_s17  ;;  %p4751_p9 = scmp.lt.u32.totalorder %s6019_s7, %s6072_s3 }
 0x232   : > { %p4752_p10 = scmp.lt.u32.totalorder %s4750_s25, %s4746_s17  ;;  %p4754_p12 = scmp.lt.u32.totalorder %s4746_s17, %s6019_s7 }
 0x233   : > { %p4748_p7 = pnand %p4747_p4, %p4857_p5 }
 0x234   : > { %p4753_p11 = por %p4752_p10, %p4751_p9 }
 0x235   : > { %p4749_p8 = pneg %p4748_p7 }
 0x236   : > { %p4755_p13 = por %p4754_p12, %p4753_p11 }
 0x238   : > { %p4756_p0 = pnand %p4755_p13, %p4749_p8 }
 0x23a   : > { %4759 = shalt.err (!%p4756_p0)
}
 0x23b   : > { %s4797_s27 = smov 128   ;;  %s4798_s28 = smov 8  }
 0x23c   : > { %4679 = dma.vmem_to_hbm [thread:$0]  (%p4857_p5), %s6021_s4, 4096, %s6019_s7, %s6028_s16, %s4797_s27, %s4797_s27, %s4798_s28  }
 0x23d PF: > { %p4685_p1 = scmp.ge.s32.totalorder %s4794_s15, 2  ;;  %s2778_s29 = sand.u32 1, %s4782_s12  }
 0x23e   : > { %s2779_s30 = scalar_lea.sflag [#allocation3], %s2778_s29 }
 0x23f   : > { %p4682_p2 = pnand %p4685_p1, %p4861_p6 }
 0x241   : > { %4777 = dma.done.wait (!%p4682_p2), %s2779_s30, 4096  }
 0x242   : > { %4779 = vsyncadd (!%p4682_p2), %s2779_s30, 4294963200  ;;  %p13_p3 = scmp.ge.s32.totalorder %s4844_s18, 4   ;;  %s6143_s12 = smov %s4786_s13 }
 0x243   : > { %s6144_s13 = smov %s4790_s14  ;;  %s6145_s14 = smov %s4855_s21 }
 0x244   : > { %s6146_s15 = smov %s4844_s18  ;;  %15 = sbr.rel (!%p13_p3) target bundleno = 3 (0x3), region = 75 }
 0x24b   :  { %2784 = vsyncpa [#allocation3], 1 }
 0x24c   :  { %2786 = vsyncpa [#allocation3 + $0x1], 1 }

</bundles_post_ra>
